<compile_context>
chip_gen: v5e
topology: v5e:2x2
jax: 0.10.0
libtpu: 0.0.40
codegen_flags: <defaults>
</compile_context>

<pallas_src>
import functools

import jax
import jax.numpy as jnp
from jax import lax
from jax.experimental import pallas as pl
from jax.experimental.pallas import tpu as pltpu


# ----------------------------------------------------------------------------
# In-kernel building blocks (traced helpers, channels-last (L, C) layout)
# ----------------------------------------------------------------------------
def _maxpool4(y):
    # MaxPool1d(kernel=4, stride=4), floor mode.
    L, C = y.shape
    Lp = (L - 4) // 4 + 1
    return y[:Lp * 4].reshape(Lp, 4, C).max(axis=1)


def _conv3_widek_relu_pool(x, w_cat, b):
    # Conv1d(k=3, stride=1, pad=1) + folded-BN bias + ReLU + MaxPool1d(4,4).
    # The 3 taps are folded into the contraction dim of a single MXU matmul:
    #   lhs[l, k*C_in + c] = x[l + k - 1, c]   (zero at the boundaries)
    L, C_in = x.shape
    zero = jnp.zeros((1, C_in), jnp.float32)
    x_m1 = jnp.concatenate([zero, x[:L - 1]], axis=0)   # x[l-1]
    x_p1 = jnp.concatenate([x[1:], zero], axis=0)       # x[l+1]
    lhs = jnp.concatenate([x_m1, x, x_p1], axis=-1)     # (L, 3*C_in), k-major
    y = jnp.dot(lhs, w_cat, preferred_element_type=jnp.float32) + b
    y = jnp.maximum(y, 0.0)
    return _maxpool4(y)


def _fused_m5_kernel(x1_ref, w1_ref, b1_ref, w2_ref, b2_ref, w3_ref, b3_ref,
                     w4_ref, b4_ref, fcw_ref, fcb_ref, o_ref):
    # x1_ref : (1, L1, 128)  conv1 im2col LHS (lane-dense, zero-padded cols)
    # wN_ref : (K*C_in, C_out) BN-folded weights ; bN_ref : (1, C_out)
    # fcw_ref: (4*n_channel, n_out) with 1/L of the avg pool folded in
    # o_ref  : (1, 1, n_out)
    # ---- conv1: one MXU matmul over the prebuilt im2col LHS ----
    y = jnp.dot(x1_ref[0], w1_ref[...], preferred_element_type=jnp.float32)
    y = jnp.maximum(y + b1_ref[...], 0.0)
    x = _maxpool4(y)
    # ---- conv2..conv4: wide-K single matmul each ----
    x = _conv3_widek_relu_pool(x, w2_ref[...], b2_ref[...])
    x = _conv3_widek_relu_pool(x, w3_ref[...], b3_ref[...])
    x = _conv3_widek_relu_pool(x, w4_ref[...], b4_ref[...])
    # ---- head: avg_pool1d(full length) (1/L folded into fcw) + Linear + log_softmax
    s = jnp.sum(x, axis=0, keepdims=True)                       # (1, 4*n_channel)
    logits = jnp.dot(s, fcw_ref[...], preferred_element_type=jnp.float32) + fcb_ref[...]
    m = jnp.max(logits, axis=-1, keepdims=True)
    z = logits - m
    lse = jnp.log(jnp.sum(jnp.exp(z), axis=-1, keepdims=True))
    o_ref[0] = (z - lse).astype(o_ref.dtype)


# ----------------------------------------------------------------------------
# Boundary glue: conv1 im2col (lane-dense) built once on the raw input
# ----------------------------------------------------------------------------
def _conv1_im2col(x_nlc, K, stride, padding, pad_cols_to=128):
    B, L, C_in = x_nlc.shape
    L_out = (L + 2 * padding - K) // stride + 1
    x_pad = jnp.pad(x_nlc, ((0, 0), (padding, padding), (0, 0)))
    idx = jnp.arange(L_out)[:, None] * stride + jnp.arange(K)[None, :]   # (L_out, K)
    lhs = x_pad[:, idx, :].reshape(B, L_out, K * C_in)                   # k-major
    kc = K * C_in
    kc_pad = -(-kc // pad_cols_to) * pad_cols_to
    if kc_pad != kc:
        lhs = jnp.pad(lhs, ((0, 0), (0, 0), (0, kc_pad - kc)))
    return lhs, L_out, kc_pad


# ----------------------------------------------------------------------------
# Parameter init (deterministic, synthetic) + BN fold (inference stats)
# ----------------------------------------------------------------------------
def init_m5_params(key, in_channels=1, n_channel=32, n_output=35):
    specs = [
        (in_channels, n_channel, 80),
        (n_channel, n_channel, 3),
        (n_channel, 2 * n_channel, 3),
        (2 * n_channel, 4 * n_channel, 3),
    ]
    eps = 1e-5
    params = {"convs": []}
    for cin, cout, k in specs:
        key, k1, k2, k3, k4 = jax.random.split(key, 5)
        w = jax.random.normal(k1, (cout, cin, k), jnp.float32) * 0.05   # torch OIK
        b = jax.random.normal(k2, (cout,), jnp.float32) * 0.05
        gamma = 1.0 + 0.1 * jax.random.normal(k3, (cout,), jnp.float32)
        beta = 0.1 * jax.random.normal(k4, (cout,), jnp.float32)
        running_mean = jnp.zeros((cout,), jnp.float32)
        running_var = jnp.ones((cout,), jnp.float32)
        scale = gamma / jnp.sqrt(running_var + eps)
        w_eff = w * scale[:, None, None]                 # BN folded into conv
        b_eff = (b - running_mean) * scale + beta
        # (K, C_in, C_out) -> (K*C_in, C_out), k-major (matches im2col LHS layout)
        w_cat = jnp.transpose(w_eff, (2, 1, 0)).reshape(k * cin, cout)
        params["convs"].append({"w_cat": w_cat, "b": b_eff, "w_oik": w_eff})
    key, k1, k2 = jax.random.split(key, 3)
    fc_w = jax.random.normal(k1, (n_output, 4 * n_channel), jnp.float32) * 0.05
    params["fc_w"] = fc_w
    params["fc_w_t"] = fc_w.T                            # pre-transposed once
    params["fc_b"] = jax.random.normal(k2, (n_output,), jnp.float32) * 0.05
    return params


# ----------------------------------------------------------------------------
# M5 forward (single fused Pallas kernel) and a pure-JAX reference
# ----------------------------------------------------------------------------
def m5_forward_pallas(params, x_ncl, stride=4):
    # x_ncl: (B, C_in, L) like PyTorch NCL -> NLC once at the boundary
    x = jnp.transpose(x_ncl, (0, 2, 1)).astype(jnp.float32)
    B, L, C_in = x.shape
    convs = params["convs"]

    # conv1 im2col (only boundary glue left; stride=1 layers need none)
    K1 = convs[0]["w_cat"].shape[0] // C_in
    lhs1, L1, kc1 = _conv1_im2col(x, K=K1, stride=stride, padding=38, pad_cols_to=128)
    w1 = convs[0]["w_cat"]
    if w1.shape[0] != kc1:
        w1 = jnp.pad(w1, ((0, kc1 - w1.shape[0]), (0, 0)))
    b1 = convs[0]["b"].reshape(1, -1)
    w2, b2 = convs[1]["w_cat"], convs[1]["b"].reshape(1, -1)
    w3, b3 = convs[2]["w_cat"], convs[2]["b"].reshape(1, -1)
    w4, b4 = convs[3]["w_cat"], convs[3]["b"].reshape(1, -1)

    # final length after the 4 pool stages -> fold 1/L of avg_pool1d into fc_w
    def _pooled(l):
        return (l - 4) // 4 + 1
    Lp = _pooled(L1)
    for _ in range(3):          # conv2..4 preserve length, then pool
        Lp = _pooled(Lp)
    fcw = params["fc_w_t"] * (1.0 / Lp)
    fcb = params["fc_b"].reshape(1, -1)
    n_out = fcb.shape[-1]

    def _fixed(shape):          # whole-array block, loaded into VMEM once
        nd = len(shape)
        return pl.BlockSpec(shape, lambda i, _nd=nd: (0,) * _nd)

    return pl.pallas_call(
        _fused_m5_kernel,
        out_shape=jax.ShapeDtypeStruct((B, 1, n_out), jnp.float32),
        grid=(B,),
        in_specs=[
            pl.BlockSpec((1, L1, kc1), lambda i: (i, 0, 0)),
            _fixed(w1.shape), _fixed(b1.shape),
            _fixed(w2.shape), _fixed(b2.shape),
            _fixed(w3.shape), _fixed(b3.shape),
            _fixed(w4.shape), _fixed(b4.shape),
            _fixed(fcw.shape), _fixed(fcb.shape),
        ],
        out_specs=pl.BlockSpec((1, 1, n_out), lambda i: (i, 0, 0)),
        compiler_params=pltpu.CompilerParams(dimension_semantics=("parallel",)),
    )(lhs1, w1, b1, w2, b2, w3, b3, w4, b4, fcw, fcb)


def m5_forward_reference(params, x_ncl, stride=4):
    x = x_ncl.astype(jnp.float32)
    cfgs = [(stride, 38), (1, 1), (1, 1), (1, 1)]
    for p, (s, pad) in zip(params["convs"], cfgs):
        x = lax.conv_general_dilated(x, p["w_oik"], window_strides=(s,),
                                     padding=[(pad, pad)],
                                     dimension_numbers=("NCH", "OIH", "NCH"))
        x = jnp.maximum(x + p["b"][None, :, None], 0.0)
        B, C, L = x.shape
        Lp = (L - 4) // 4 + 1
        x = x[:, :, :Lp * 4].reshape(B, C, Lp, 4).max(axis=-1)
    x = jnp.mean(x, axis=-1, keepdims=True)            # avg_pool1d over full length
    x = jnp.transpose(x, (0, 2, 1))                    # (B, 1, C)
    logits = x @ params["fc_w"].T + params["fc_b"]
    return jax.nn.log_softmax(logits, axis=2)


if __name__ == "__main__":
    key = jax.random.PRNGKey(0)
    key, pkey, xkey = jax.random.split(key, 3)

    B, C_in, L = 2, 1, 1024            # small shapes consistent with the module
    n_channel, n_output = 32, 35

    params = init_m5_params(pkey, in_channels=C_in, n_channel=n_channel,
                            n_output=n_output)
    x = jax.random.normal(xkey, (B, C_in, L), jnp.float32)

    fwd = jax.jit(functools.partial(m5_forward_pallas, stride=4))
    out = jax.block_until_ready(fwd(params, x))

    ref = m5_forward_reference(params, x, stride=4)
    assert out.shape == (B, 1, n_output), out.shape
    if not bool(jnp.allclose(out, ref, atol=1e-3, rtol=1e-3)):
        raise AssertionError(
            f"mismatch vs reference, max abs err {float(jnp.max(jnp.abs(out - ref)))}")

    print("KERNEL_OK")
</pallas_src>

<mosaic_0001>
module attributes {stable_mosaic.version = 11 : i64} {
  func.func @_fused_m5_kernel(%arg0: i32, %arg1: memref<1x256x128xf32, #tpu.memory_space<vmem>>, %arg2: memref<128x32xf32, #tpu.memory_space<vmem>>, %arg3: memref<1x32xf32, #tpu.memory_space<vmem>>, %arg4: memref<96x32xf32, #tpu.memory_space<vmem>>, %arg5: memref<1x32xf32, #tpu.memory_space<vmem>>, %arg6: memref<96x64xf32, #tpu.memory_space<vmem>>, %arg7: memref<1x64xf32, #tpu.memory_space<vmem>>, %arg8: memref<192x128xf32, #tpu.memory_space<vmem>>, %arg9: memref<1x128xf32, #tpu.memory_space<vmem>>, %arg10: memref<128x35xf32, #tpu.memory_space<vmem>>, %arg11: memref<1x35xf32, #tpu.memory_space<vmem>>, %arg12: memref<1x1x35xf32, #tpu.memory_space<vmem>>) attributes {dimension_semantics = [#tpu.dimension_semantics<parallel>], iteration_bounds = array<i64: 2>, scalar_prefetch = 0 : i64, scratch_operands = 0 : i64, tpu.core_type = #tpu.core_type<tc>, window_params = [{transform_indices = @transform_0, window_bounds = array<i64: 1, 256, 128>}, {pipeline_mode = #tpu.pipeline_mode<synchronous>, transform_indices = @transform_1, window_bounds = array<i64: 128, 32>}, {pipeline_mode = #tpu.pipeline_mode<synchronous>, transform_indices = @transform_2, window_bounds = array<i64: 1, 32>}, {pipeline_mode = #tpu.pipeline_mode<synchronous>, transform_indices = @transform_3, window_bounds = array<i64: 96, 32>}, {pipeline_mode = #tpu.pipeline_mode<synchronous>, transform_indices = @transform_4, window_bounds = array<i64: 1, 32>}, {pipeline_mode = #tpu.pipeline_mode<synchronous>, transform_indices = @transform_5, window_bounds = array<i64: 96, 64>}, {pipeline_mode = #tpu.pipeline_mode<synchronous>, transform_indices = @transform_6, window_bounds = array<i64: 1, 64>}, {pipeline_mode = #tpu.pipeline_mode<synchronous>, transform_indices = @transform_7, window_bounds = array<i64: 192, 128>}, {pipeline_mode = #tpu.pipeline_mode<synchronous>, transform_indices = @transform_8, window_bounds = array<i64: 1, 128>}, {pipeline_mode = #tpu.pipeline_mode<synchronous>, transform_indices = @transform_9, window_bounds = array<i64: 128, 35>}, {pipeline_mode = #tpu.pipeline_mode<synchronous>, transform_indices = @transform_10, window_bounds = array<i64: 1, 35>}, {transform_indices = @transform_11, window_bounds = array<i64: 1, 1, 35>}]} {
    %c0 = arith.constant 0 : index
    %c0_0 = arith.constant 0 : index
    %c0_1 = arith.constant 0 : index
    %0 = vector.load %arg1[%c0, %c0_0, %c0_1] : memref<1x256x128xf32, #tpu.memory_space<vmem>>, vector<1x256x128xf32>
    %1 = vector.shape_cast %0 : vector<1x256x128xf32> to vector<256x128xf32>
    %c0_2 = arith.constant 0 : index
    %c0_3 = arith.constant 0 : index
    %2 = vector.load %arg2[%c0_2, %c0_3] : memref<128x32xf32, #tpu.memory_space<vmem>>, vector<128x32xf32>
    %cst = arith.constant dense<0.000000e+00> : vector<256x32xf32>
    %3 = tpu.matmul %1, %2, %cst {dimension_numbers = #tpu.dot_dimension_numbers<[1], [0], [0], [1], [0, 0, 1, 1], [], []>} : vector<256x128xf32>, vector<128x32xf32>, vector<256x32xf32> -> vector<256x32xf32>
    %c0_4 = arith.constant 0 : index
    %c0_5 = arith.constant 0 : index
    %4 = vector.load %arg3[%c0_4, %c0_5] : memref<1x32xf32, #tpu.memory_space<vmem>>, vector<1x32xf32>
    %5 = vector.broadcast %4 : vector<1x32xf32> to vector<256x32xf32>
    %6 = arith.addf %3, %5 : vector<256x32xf32>
    %cst_6 = arith.constant 0.000000e+00 : f32
    %7 = vector.broadcast %cst_6 : f32 to vector<256x32xf32>
    %8 = arith.maximumf %6, %7 : vector<256x32xf32>
    %9 = vector.shape_cast %8 : vector<256x32xf32> to vector<64x4x32xf32>
    %cst_7 = arith.constant dense<0xFF800000> : vector<64x32xf32>
    %10 = vector.multi_reduction <maximumf>, %9, %cst_7 [1] : vector<64x4x32xf32> to vector<64x32xf32>
    %c0_8 = arith.constant 0 : index
    %c0_9 = arith.constant 0 : index
    %11 = vector.load %arg4[%c0_8, %c0_9] : memref<96x32xf32, #tpu.memory_space<vmem>>, vector<96x32xf32>
    %c0_10 = arith.constant 0 : index
    %c0_11 = arith.constant 0 : index
    %12 = vector.load %arg5[%c0_10, %c0_11] : memref<1x32xf32, #tpu.memory_space<vmem>>, vector<1x32xf32>
    %cst_12 = arith.constant 0.000000e+00 : f32
    %13 = vector.broadcast %cst_12 : f32 to vector<1x32xf32>
    %14 = vector.extract_strided_slice %10 {offsets = [0, 0], sizes = [63, 32], strides = [1, 1]} : vector<64x32xf32> to vector<63x32xf32>
    %15 = tpu.concatenate %13, %14 in 0 : vector<1x32xf32>, vector<63x32xf32> -> vector<64x32xf32>
    %16 = vector.extract_strided_slice %10 {offsets = [1, 0], sizes = [63, 32], strides = [1, 1]} : vector<64x32xf32> to vector<63x32xf32>
    %17 = tpu.concatenate %16, %13 in 0 : vector<63x32xf32>, vector<1x32xf32> -> vector<64x32xf32>
    %18 = tpu.concatenate %15, %10, %17 in 1 : vector<64x32xf32>, vector<64x32xf32>, vector<64x32xf32> -> vector<64x96xf32>
    %cst_13 = arith.constant dense<0.000000e+00> : vector<64x32xf32>
    %19 = tpu.matmul %18, %11, %cst_13 {dimension_numbers = #tpu.dot_dimension_numbers<[1], [0], [0], [1], [0, 0, 1, 1], [], []>} : vector<64x96xf32>, vector<96x32xf32>, vector<64x32xf32> -> vector<64x32xf32>
    %20 = vector.broadcast %12 : vector<1x32xf32> to vector<64x32xf32>
    %21 = arith.addf %19, %20 : vector<64x32xf32>
    %cst_14 = arith.constant 0.000000e+00 : f32
    %22 = vector.broadcast %cst_14 : f32 to vector<64x32xf32>
    %23 = arith.maximumf %21, %22 : vector<64x32xf32>
    %24 = vector.shape_cast %23 : vector<64x32xf32> to vector<16x4x32xf32>
    %cst_15 = arith.constant dense<0xFF800000> : vector<16x32xf32>
    %25 = vector.multi_reduction <maximumf>, %24, %cst_15 [1] : vector<16x4x32xf32> to vector<16x32xf32>
    %c0_16 = arith.constant 0 : index
    %c0_17 = arith.constant 0 : index
    %26 = vector.load %arg6[%c0_16, %c0_17] : memref<96x64xf32, #tpu.memory_space<vmem>>, vector<96x64xf32>
    %c0_18 = arith.constant 0 : index
    %c0_19 = arith.constant 0 : index
    %27 = vector.load %arg7[%c0_18, %c0_19] : memref<1x64xf32, #tpu.memory_space<vmem>>, vector<1x64xf32>
    %cst_20 = arith.constant 0.000000e+00 : f32
    %28 = vector.broadcast %cst_20 : f32 to vector<1x32xf32>
    %29 = vector.extract_strided_slice %25 {offsets = [0, 0], sizes = [15, 32], strides = [1, 1]} : vector<16x32xf32> to vector<15x32xf32>
    %30 = tpu.concatenate %28, %29 in 0 : vector<1x32xf32>, vector<15x32xf32> -> vector<16x32xf32>
    %31 = vector.extract_strided_slice %25 {offsets = [1, 0], sizes = [15, 32], strides = [1, 1]} : vector<16x32xf32> to vector<15x32xf32>
    %32 = tpu.concatenate %31, %28 in 0 : vector<15x32xf32>, vector<1x32xf32> -> vector<16x32xf32>
    %33 = tpu.concatenate %30, %25, %32 in 1 : vector<16x32xf32>, vector<16x32xf32>, vector<16x32xf32> -> vector<16x96xf32>
    %cst_21 = arith.constant dense<0.000000e+00> : vector<16x64xf32>
    %34 = tpu.matmul %33, %26, %cst_21 {dimension_numbers = #tpu.dot_dimension_numbers<[1], [0], [0], [1], [0, 0, 1, 1], [], []>} : vector<16x96xf32>, vector<96x64xf32>, vector<16x64xf32> -> vector<16x64xf32>
    %35 = vector.broadcast %27 : vector<1x64xf32> to vector<16x64xf32>
    %36 = arith.addf %34, %35 : vector<16x64xf32>
    %cst_22 = arith.constant 0.000000e+00 : f32
    %37 = vector.broadcast %cst_22 : f32 to vector<16x64xf32>
    %38 = arith.maximumf %36, %37 : vector<16x64xf32>
    %39 = vector.shape_cast %38 : vector<16x64xf32> to vector<4x4x64xf32>
    %cst_23 = arith.constant dense<0xFF800000> : vector<4x64xf32>
    %40 = vector.multi_reduction <maximumf>, %39, %cst_23 [1] : vector<4x4x64xf32> to vector<4x64xf32>
    %c0_24 = arith.constant 0 : index
    %c0_25 = arith.constant 0 : index
    %41 = vector.load %arg8[%c0_24, %c0_25] : memref<192x128xf32, #tpu.memory_space<vmem>>, vector<192x128xf32>
    %c0_26 = arith.constant 0 : index
    %c0_27 = arith.constant 0 : index
    %42 = vector.load %arg9[%c0_26, %c0_27] : memref<1x128xf32, #tpu.memory_space<vmem>>, vector<1x128xf32>
    %cst_28 = arith.constant 0.000000e+00 : f32
    %43 = vector.broadcast %cst_28 : f32 to vector<1x64xf32>
    %44 = vector.extract_strided_slice %40 {offsets = [0, 0], sizes = [3, 64], strides = [1, 1]} : vector<4x64xf32> to vector<3x64xf32>
    %45 = tpu.concatenate %43, %44 in 0 : vector<1x64xf32>, vector<3x64xf32> -> vector<4x64xf32>
    %46 = vector.extract_strided_slice %40 {offsets = [1, 0], sizes = [3, 64], strides = [1, 1]} : vector<4x64xf32> to vector<3x64xf32>
    %47 = tpu.concatenate %46, %43 in 0 : vector<3x64xf32>, vector<1x64xf32> -> vector<4x64xf32>
    %48 = tpu.concatenate %45, %40, %47 in 1 : vector<4x64xf32>, vector<4x64xf32>, vector<4x64xf32> -> vector<4x192xf32>
    %cst_29 = arith.constant dense<0.000000e+00> : vector<4x128xf32>
    %49 = tpu.matmul %48, %41, %cst_29 {dimension_numbers = #tpu.dot_dimension_numbers<[1], [0], [0], [1], [0, 0, 1, 1], [], []>} : vector<4x192xf32>, vector<192x128xf32>, vector<4x128xf32> -> vector<4x128xf32>
    %50 = vector.broadcast %42 : vector<1x128xf32> to vector<4x128xf32>
    %51 = arith.addf %49, %50 : vector<4x128xf32>
    %cst_30 = arith.constant 0.000000e+00 : f32
    %52 = vector.broadcast %cst_30 : f32 to vector<4x128xf32>
    %53 = arith.maximumf %51, %52 : vector<4x128xf32>
    %54 = vector.shape_cast %53 : vector<4x128xf32> to vector<1x4x128xf32>
    %cst_31 = arith.constant dense<0xFF800000> : vector<1x128xf32>
    %55 = vector.multi_reduction <maximumf>, %54, %cst_31 [1] : vector<1x4x128xf32> to vector<1x128xf32>
    %cst_32 = arith.constant dense<0.000000e+00> : vector<128xf32>
    %56 = vector.multi_reduction <add>, %55, %cst_32 [0] : vector<1x128xf32> to vector<128xf32>
    %57 = vector.shape_cast %56 : vector<128xf32> to vector<1x128xf32>
    %c0_33 = arith.constant 0 : index
    %c0_34 = arith.constant 0 : index
    %58 = vector.load %arg10[%c0_33, %c0_34] : memref<128x35xf32, #tpu.memory_space<vmem>>, vector<128x35xf32>
    %cst_35 = arith.constant dense<0.000000e+00> : vector<1x35xf32>
    %59 = tpu.matmul %57, %58, %cst_35 {dimension_numbers = #tpu.dot_dimension_numbers<[1], [0], [0], [1], [0, 0, 1, 1], [], []>} : vector<1x128xf32>, vector<128x35xf32>, vector<1x35xf32> -> vector<1x35xf32>
    %c0_36 = arith.constant 0 : index
    %c0_37 = arith.constant 0 : index
    %60 = vector.load %arg11[%c0_36, %c0_37] : memref<1x35xf32, #tpu.memory_space<vmem>>, vector<1x35xf32>
    %61 = arith.addf %59, %60 : vector<1x35xf32>
    %cst_38 = arith.constant dense<0xFF800000> : vector<1xf32>
    %62 = vector.multi_reduction <maximumf>, %61, %cst_38 [1] : vector<1x35xf32> to vector<1xf32>
    %63 = vector.shape_cast %62 : vector<1xf32> to vector<1x1xf32>
    %64 = vector.broadcast %63 : vector<1x1xf32> to vector<1x35xf32>
    %65 = arith.subf %61, %64 : vector<1x35xf32>
    %66 = math.exp %65 : vector<1x35xf32>
    %cst_39 = arith.constant dense<0.000000e+00> : vector<1xf32>
    %67 = vector.multi_reduction <add>, %66, %cst_39 [1] : vector<1x35xf32> to vector<1xf32>
    %68 = vector.shape_cast %67 : vector<1xf32> to vector<1x1xf32>
    %69 = math.log %68 : vector<1x1xf32>
    %70 = vector.broadcast %69 : vector<1x1xf32> to vector<1x35xf32>
    %71 = arith.subf %65, %70 : vector<1x35xf32>
    %c0_40 = arith.constant 0 : index
    %c0_41 = arith.constant 0 : index
    %c0_42 = arith.constant 0 : index
    %72 = vector.load %arg12[%c0_40, %c0_41, %c0_42] : memref<1x1x35xf32, #tpu.memory_space<vmem>>, vector<1x1x35xf32>
    %73 = vector.shape_cast %72 : vector<1x1x35xf32> to vector<1x35xf32>
    %74 = vector.shape_cast %71 : vector<1x35xf32> to vector<1x1x35xf32>
    tpu.vector_store %arg12[%c0_40, %c0_41, %c0_42], %74 {strides = array<i32>} : memref<1x1x35xf32, #tpu.memory_space<vmem>>, vector<1x1x35xf32>,
    return
  }
  func.func @transform_0(%arg0: i32) -> (i32, i32, i32) {
    %c0_i32 = arith.constant 0 : i32
    %c0_i32_0 = arith.constant 0 : i32
    %c0_i32_1 = arith.constant 0 : i32
    return %arg0, %c0_i32, %c0_i32_0 : i32, i32, i32
  }
  func.func @transform_1(%arg0: i32) -> (i32, i32) {
    %c0_i32 = arith.constant 0 : i32
    %c0_i32_0 = arith.constant 0 : i32
    %c0_i32_1 = arith.constant 0 : i32
    return %c0_i32, %c0_i32_0 : i32, i32
  }
  func.func @transform_2(%arg0: i32) -> (i32, i32) {
    %c0_i32 = arith.constant 0 : i32
    %c0_i32_0 = arith.constant 0 : i32
    %c0_i32_1 = arith.constant 0 : i32
    return %c0_i32, %c0_i32_0 : i32, i32
  }
  func.func @transform_3(%arg0: i32) -> (i32, i32) {
    %c0_i32 = arith.constant 0 : i32
    %c0_i32_0 = arith.constant 0 : i32
    %c0_i32_1 = arith.constant 0 : i32
    return %c0_i32, %c0_i32_0 : i32, i32
  }
  func.func @transform_4(%arg0: i32) -> (i32, i32) {
    %c0_i32 = arith.constant 0 : i32
    %c0_i32_0 = arith.constant 0 : i32
    %c0_i32_1 = arith.constant 0 : i32
    return %c0_i32, %c0_i32_0 : i32, i32
  }
  func.func @transform_5(%arg0: i32) -> (i32, i32) {
    %c0_i32 = arith.constant 0 : i32
    %c0_i32_0 = arith.constant 0 : i32
    %c0_i32_1 = arith.constant 0 : i32
    return %c0_i32, %c0_i32_0 : i32, i32
  }
  func.func @transform_6(%arg0: i32) -> (i32, i32) {
    %c0_i32 = arith.constant 0 : i32
    %c0_i32_0 = arith.constant 0 : i32
    %c0_i32_1 = arith.constant 0 : i32
    return %c0_i32, %c0_i32_0 : i32, i32
  }
  func.func @transform_7(%arg0: i32) -> (i32, i32) {
    %c0_i32 = arith.constant 0 : i32
    %c0_i32_0 = arith.constant 0 : i32
    %c0_i32_1 = arith.constant 0 : i32
    return %c0_i32, %c0_i32_0 : i32, i32
  }
  func.func @transform_8(%arg0: i32) -> (i32, i32) {
    %c0_i32 = arith.constant 0 : i32
    %c0_i32_0 = arith.constant 0 : i32
    %c0_i32_1 = arith.constant 0 : i32
    return %c0_i32, %c0_i32_0 : i32, i32
  }
  func.func @transform_9(%arg0: i32) -> (i32, i32) {
    %c0_i32 = arith.constant 0 : i32
    %c0_i32_0 = arith.constant 0 : i32
    %c0_i32_1 = arith.constant 0 : i32
    return %c0_i32, %c0_i32_0 : i32, i32
  }
  func.func @transform_10(%arg0: i32) -> (i32, i32) {
    %c0_i32 = arith.constant 0 : i32
    %c0_i32_0 = arith.constant 0 : i32
    %c0_i32_1 = arith.constant 0 : i32
    return %c0_i32, %c0_i32_0 : i32, i32
  }
  func.func @transform_11(%arg0: i32) -> (i32, i32, i32) {
    %c0_i32 = arith.constant 0 : i32
    %c0_i32_0 = arith.constant 0 : i32
    %c0_i32_1 = arith.constant 0 : i32
    return %arg0, %c0_i32, %c0_i32_0 : i32, i32, i32
  }
}

</mosaic_0001>

<bundles_post_ra>
// kernel: m5_forward_pallas.1
= control target key start
LH: loop header
LB: loop body
LE: loop exit
PB: predicated region body
PF: predicated region fallthrough
CT: control target
= control target key end

     0   :  { %s3539_s0 = inlined_call_operand.vmem [shape: f32[2,256,128], index: 0, kind: input, shape index: {}]   ;;  %s3540_s1 = inlined_call_operand.vmem [shape: f32[128,32], index: 1, kind: input, shape index: {}]   ;;  %s3541_s2 = inlined_call_operand.vmem [shape: f32[1,32], index: 2, kind: input, shape index: {}]   ;;  %s3542_s3 = inlined_call_operand.vmem [shape: f32[96,32], index: 3, kind: input, shape index: {}]   ;;  %s3543_s4 = inlined_call_operand.vmem [shape: f32[1,32], index: 4, kind: input, shape index: {}]   ;;  %s3544_s5 = inlined_call_operand.vmem [shape: f32[96,64], index: 5, kind: input, shape index: {}]   ;;  %s3545_s6 = inlined_call_operand.vmem [shape: f32[1,64], index: 6, kind: input, shape index: {}]   ;;  %s3546_s7 = inlined_call_operand.vmem [shape: f32[192,128], index: 7, kind: input, shape index: {}]   ;;  %s3547_s8 = inlined_call_operand.vmem [shape: f32[1,128], index: 8, kind: input, shape index: {}]   ;;  %s3548_s9 = inlined_call_operand.vmem [shape: f32[128,35], index: 9, kind: input, shape index: {}]   ;;  %s3549_s10 = inlined_call_operand.vmem [shape: f32[1,35], index: 10, kind: input, shape index: {}]   ;;  %s3550_s11 = inlined_call_operand.hbm [shape: f32[2,1,35], index: 11, kind: output, shape index: {}]  }
   0x1   :  { %3573 = sst [smem:[#allocation23_spill]] %s3539_s0 }
   0x2   :  { %16 = vsyncpa [#allocation3], 0 }
   0x3   :  { %18 = vsyncpa [#allocation3 + $0x1], 0  ;;  %s2293_s17 = smov 0   ;;  %s2295_s18 = smov 0  }
   0x4   :  { %s2297_s19 = smov 0   ;;  %s2299_s20 = smov 0  }
   0x5 LB: > { %s2314_s21 = sadd.s32 4294967295, %s2229_s20   ;;  %s2049_s22 = sadd.s32 4294967294, %s2229_s20   ;;  %s2229_s20 = sphi %s2299_s20, %s3625_s20   ;;  %s2225_s19 = sphi %s2297_s19, %s3624_s19   ;;  %s2221_s18 = sphi %s2295_s18, %s3623_s18   ;;  %s2217_s17 = sphi %s2293_s17, %s3622_s17  }
   0x6   : > { %s2318_s23 = sadd.s32 1, %s2229_s20   ;;  %s267_s24 = sadd.s32 1, %s2225_s19 }
   0x7   : > { %s264_s25 = ssub.s32 %s2229_s20, %s2318_s23  ;;  %p277_p0 = scmp.ne.s32.totalorder %s2225_s19, %s2221_s18 }
   0x8   : > { %p265_p1 = scmp.eq.s32.totalorder %s264_s25, 0  ;;  %p278_p2 = scmp.eq.s32.totalorder %s2314_s21, 1 }
   0x9   : > { %p283_p3 = scmp.ne.s32.totalorder %s2221_s18, %s2217_s17  ;;  %p284_p4 = scmp.eq.s32.totalorder %s2049_s22, 1 }
   0xa   : > { %s2329_s26 = scalar_select %p265_p1, %s2225_s19, %s267_s24  }
   0xb   : > { %p2331_p5 = por %p278_p2, %p277_p0  ;;  %p2335_p6 = por %p284_p4, %p283_p3 }
   0xc   : > { %p2052_p7 = scmp.ge.s32.totalorder %s2229_s20, 1  ;;  %p340_p8 = scmp.lt.s32.totalorder %s2229_s20, 3 }
   0xe   : > { %p341_p9 = pnand %p2052_p7, %p340_p8 }
  0x10   : > { %344 = sbr.rel (%p341_p9) target bundleno = 1540 (0x604), region = 64 }
  0x15   : > { %v431_v0 = vld [vmem:[%s3540_s1 + $0x78] sm:$0xff]  ;;  %v430_v1 = vld [vmem:[%s3540_s1 + $0x70] sm:$0xff]  ;;  %v429_v2 = vld [vmem:[%s3540_s1 + $0x68] sm:$0xff]  ;;  %p379_p10 = scmp.lt.s32.totalorder %s2314_s21, 1  ;;  %s3576_s0 = sld [smem:[#allocation23_spill]]  ;;  %vm677_vm0 = vcmask 257024  }
  0x16   : > { %436 = vmatpush.msra.mxu0 %v431_v0  ;;  %2069 = vmatpush.msra.mxu1 %v431_v0  ;;  %v428_v3 = vld [vmem:[%s3540_s1 + $0x60] sm:$0xff]  ;;  %v427_v4 = vld [vmem:[%s3540_s1 + $0x58] sm:$0xff]  ;;  %v426_v5 = vld [vmem:[%s3540_s1 + $0x50] sm:$0xff]  ;;  %vm1202_vm1 = vcmask 1042434   ;;  %vm1214_vm2 = vcmask 1041409   ;;  %vm1204_vm3 = vcmask 1043459  }
  0x17   : > { %2070 = vmatpush.msra.mxu2 %v431_v0  ;;  %2071 = vmatpush.msra.mxu3 %v431_v0  ;;  %v425_v6 = vld [vmem:[%s3540_s1 + $0x48] sm:$0xff]  ;;  %v424_v7 = vld [vmem:[%s3540_s1 + $0x40] sm:$0xff]  ;;  %v423_v8 = vld [vmem:[%s3540_s1 + $0x38] sm:$0xff]  ;;  %s380_s12 = scalar_select %p379_p10, %s2314_s21, 1  ;;  %vm1206_vm4 = vcmask 1044484   ;;  %vm1208_vm5 = vcmask 1045509  }
  0x18   : > { %437 = vmatpush.msra.mxu0 %v430_v1  ;;  %2072 = vmatpush.msra.mxu1 %v430_v1  ;;  %v422_v9 = vld [vmem:[%s3540_s1 + $0x30] sm:$0xff]  ;;  %v421_v10 = vld [vmem:[%s3540_s1 + $0x28] sm:$0xff]  ;;  %v420_v11 = vld [vmem:[%s3540_s1 + $0x20] sm:$0xff]  ;;  %vm1210_vm6 = vcmask 1046534   ;;  %vm1212_vm7 = vcmask 1047559   ;;  %s2231_s25 = smov 32  }
  0x19   : > { %2073 = vmatpush.msra.mxu2 %v430_v1  ;;  %2074 = vmatpush.msra.mxu3 %v430_v1  ;;  %v419_v12 = vld [vmem:[%s3540_s1 + $0x18] sm:$0xff]  ;;  %s2068_s22 = sshll.u32 %s380_s12, 8  ;;  %v418_v13 = vld [vmem:[%s3540_s1 + $0x10] sm:$0xff]  ;;  %v417_v14 = vld [vmem:[%s3540_s1 + $0x8] sm:$0xff]  ;;  %s3572_s29 = smov 64   ;;  %vm1331_vm8 = vcmask 1046528  }
  0x1a   : > { %438 = vmatpush.msra.mxu0 %v429_v2  ;;  %2075 = vmatpush.msra.mxu1 %v429_v2  ;;  %v416_v15 = vld [vmem:[%s3540_s1] sm:$0xff]  ;;  %vm1272_vm9 = vcmask 1040384   ;;  %vm1438_vm10 = vcmask 261120   ;;  %vm1447_vm11 = vcmask 523264   ;;  %vm1459_vm12 = vcmask 785408   ;;  %s377_s30 = sand.u32 1, %s2221_s18  }
  0x1b   : > { %2076 = vmatpush.msra.mxu2 %v429_v2  ;;  %2077 = vmatpush.msra.mxu3 %v429_v2  ;;  %s2391_s15 = scalar_lea.vmem %s3576_s0, %s2068_s22  ;;  %v2431_v48 = vld [vmem:[%s3541_s2] ss:$0 sm:$0xff]  ;;  %vm1800_vm13 = vcmask 519168   ;;  %vm1865_vm14 = vcmask 1042432   ;;  %vm1921_vm15 = vcmask 1043456   ;;  %s378_s12 = scalar_lea.vmem [#allocation2], %s377_s30 }
  0x1c   : > { %439 = vmatpush.msra.mxu0 %v428_v3  ;;  %2078 = vmatpush.msra.mxu1 %v428_v3  ;;  %v384_v16 = vld [vmem:[%s2391_s15] sm:$0xff]  ;;  %v409_v19 = vld [vmem:[%s2391_s15 + $0xc8] sm:$0xff]  ;;  %v410_v23 = vld [vmem:[%s2391_s15 + $0xd0] sm:$0xff]  ;;  %s1992_s16 = sshll.u32 %s378_s12, 4  ;;  %s1982_s22 = scalar_lea.sflag [#allocation3], %s377_s30  ;;  %s1993_s16 = int_to_ptr.vmem [resolvable:$true] %s1992_s16 }
  0x1d   : > { %2079 = vmatpush.msra.mxu2 %v428_v3  ;;  %2080 = vmatpush.msra.mxu3 %v428_v3  ;;  %v396_v17 = vld [vmem:[%s2391_s15 + $0x60] sm:$0xff]  ;;  %v385_v20 = vld [vmem:[%s2391_s15 + $0x8] sm:$0xff]  ;;  %v386_v24 = vld [vmem:[%s2391_s15 + $0x10] sm:$0xff]  ;;  %s2187_s14 = scalar_lea.hbm %s3550_s11, 2 }
  0x1e   : > { %440 = vmatpush.msra.mxu0 %v427_v4  ;;  %2081 = vmatpush.msra.mxu1 %v427_v4  ;;  %v400_v18 = vld [vmem:[%s2391_s15 + $0x80] sm:$0xff]  ;;  %v397_v21 = vld [vmem:[%s2391_s15 + $0x68] sm:$0xff]  ;;  %v398_v25 = vld [vmem:[%s2391_s15 + $0x70] sm:$0xff] }
  0x1f   : > { %2082 = vmatpush.msra.mxu2 %v427_v4  ;;  %2083 = vmatpush.msra.mxu3 %v427_v4  ;;  %v401_v22 = vld [vmem:[%s2391_s15 + $0x88] sm:$0xff]  ;;  %v402_v26 = vld [vmem:[%s2391_s15 + $0x90] sm:$0xff]  ;;  %v411_v27 = vld [vmem:[%s2391_s15 + $0xd8] sm:$0xff] }
  0x20   : > { %441 = vmatpush.msra.mxu0 %v426_v5  ;;  %2084 = vmatpush.msra.mxu1 %v426_v5  ;;  %v387_v28 = vld [vmem:[%s2391_s15 + $0x18] sm:$0xff]  ;;  %v412_v31 = vld [vmem:[%s2391_s15 + $0xe0] sm:$0xff]  ;;  %v413_v34 = vld [vmem:[%s2391_s15 + $0xe8] sm:$0xff] }
  0x21   : > { %2085 = vmatpush.msra.mxu2 %v426_v5  ;;  %2086 = vmatpush.msra.mxu3 %v426_v5  ;;  %v399_v29 = vld [vmem:[%s2391_s15 + $0x78] sm:$0xff]  ;;  %v388_v32 = vld [vmem:[%s2391_s15 + $0x20] sm:$0xff]  ;;  %v389_v35 = vld [vmem:[%s2391_s15 + $0x28] sm:$0xff] }
  0x22   : > { %442 = vmatpush.msra.mxu0 %v425_v6  ;;  %2087 = vmatpush.msra.mxu1 %v425_v6  ;;  %v403_v30 = vld [vmem:[%s2391_s15 + $0x98] sm:$0xff]  ;;  %v404_v33 = vld [vmem:[%s2391_s15 + $0xa0] sm:$0xff]  ;;  %v405_v36 = vld [vmem:[%s2391_s15 + $0xa8] sm:$0xff] }
  0x23   : > { %2088 = vmatpush.msra.mxu2 %v425_v6  ;;  %2089 = vmatpush.msra.mxu3 %v425_v6  ;;  %v414_v37 = vld [vmem:[%s2391_s15 + $0xf0] sm:$0xff]  ;;  %v415_v40 = vld [vmem:[%s2391_s15 + $0xf8] sm:$0xff]  ;;  %v392_v43 = vld [vmem:[%s2391_s15 + $0x40] sm:$0xff] }
  0x24   : > { %443 = vmatpush.msra.mxu0 %v424_v7  ;;  %2090 = vmatpush.msra.mxu1 %v424_v7  ;;  %v390_v38 = vld [vmem:[%s2391_s15 + $0x30] sm:$0xff]  ;;  %v391_v41 = vld [vmem:[%s2391_s15 + $0x38] sm:$0xff]  ;;  %v408_v44 = vld [vmem:[%s2391_s15 + $0xc0] sm:$0xff] }
  0x25   : > { %2091 = vmatpush.msra.mxu2 %v424_v7  ;;  %2092 = vmatpush.msra.mxu3 %v424_v7  ;;  %v406_v39 = vld [vmem:[%s2391_s15 + $0xb0] sm:$0xff]  ;;  %v407_v42 = vld [vmem:[%s2391_s15 + $0xb8] sm:$0xff]  ;;  %v393_v45 = vld [vmem:[%s2391_s15 + $0x48] sm:$0xff] }
  0x26   : > { %444 = vmatpush.msra.mxu0 %v423_v8  ;;  %2093 = vmatpush.msra.mxu1 %v423_v8  ;;  %v394_v46 = vld [vmem:[%s2391_s15 + $0x50] sm:$0xff]  ;;  %v395_v47 = vld [vmem:[%s2391_s15 + $0x58] sm:$0xff]  ;;  %s3621_s15 = smov 64  }
  0x27   : > { %2094 = vmatpush.msra.mxu2 %v423_v8  ;;  %2095 = vmatpush.msra.mxu3 %v423_v8 }
  0x28   : > { %445 = vmatpush.msra.mxu0 %v422_v9  ;;  %2096 = vmatpush.msra.mxu1 %v422_v9 }
  0x29   : > { %2097 = vmatpush.msra.mxu2 %v422_v9  ;;  %2098 = vmatpush.msra.mxu3 %v422_v9 }
  0x2a   : > { %446 = vmatpush.msra.mxu0 %v421_v10  ;;  %2099 = vmatpush.msra.mxu1 %v421_v10 }
  0x2b   : > { %2100 = vmatpush.msra.mxu2 %v421_v10  ;;  %2101 = vmatpush.msra.mxu3 %v421_v10 }
  0x2c   : > { %447 = vmatpush.msra.mxu0 %v420_v11  ;;  %2102 = vmatpush.msra.mxu1 %v420_v11 }
  0x2d   : > { %2103 = vmatpush.msra.mxu2 %v420_v11  ;;  %2104 = vmatpush.msra.mxu3 %v420_v11 }
  0x2e   : > { %448 = vmatpush.msra.mxu0 %v419_v12  ;;  %2105 = vmatpush.msra.mxu1 %v419_v12 }
  0x2f   : > { %2106 = vmatpush.msra.mxu2 %v419_v12  ;;  %2107 = vmatpush.msra.mxu3 %v419_v12 }
  0x30   : > { %449 = vmatpush.msra.mxu0 %v418_v13  ;;  %2108 = vmatpush.msra.mxu1 %v418_v13 }
  0x31   : > { %2109 = vmatpush.msra.mxu2 %v418_v13  ;;  %2110 = vmatpush.msra.mxu3 %v418_v13 }
  0x32   : > { %450 = vmatpush.msra.mxu0 %v417_v14  ;;  %2111 = vmatpush.msra.mxu1 %v417_v14 }
  0x33   : > { %2112 = vmatpush.msra.mxu2 %v417_v14  ;;  %2113 = vmatpush.msra.mxu3 %v417_v14 }
  0x34   : > { %451 = vmatpush.msra.mxu0 %v416_v15  ;;  %2114 = vmatpush.msra.mxu1 %v416_v15 }
  0x35   : > { %2115 = vmatpush.msra.mxu2 %v416_v15  ;;  %452 = vmatmul.f32.vlgmr.msra.gmra.mxu0 %v384_v16 }
  0x36   : > { %488 = vmatmul.f32.vlgmr.msra.gmra.mxu1 %v396_v17  ;;  %500 = vmatmul.f32.vlgmr.msra.gmra.mxu2 %v400_v18 }
  0x37   : > { %2116 = vmatpush.msra.mxu3 %v416_v15 }
  0x38   : > { %527 = vmatmul.f32.vlgmr.msra.gmra.mxu3 %v409_v19 }
  0x3d   : > { %455 = vmatmul.f32.gmra.mxu0 %v385_v20 }
  0x3e   : > { %491 = vmatmul.f32.gmra.mxu1 %v397_v21  ;;  %503 = vmatmul.f32.gmra.mxu2 %v401_v22 }
  0x40   : > { %530 = vmatmul.f32.gmra.mxu3 %v410_v23 }
  0x45   : > { %458 = vmatmul.f32.gmra.mxu0 %v386_v24 }
  0x46   : > { %494 = vmatmul.f32.gmra.mxu1 %v398_v25  ;;  %506 = vmatmul.f32.gmra.mxu2 %v402_v26 }
  0x48   : > { %533 = vmatmul.f32.gmra.mxu3 %v411_v27 }
  0x4d   : > { %461 = vmatmul.f32.gmra.mxu0 %v387_v28 }
  0x4e   : > { %497 = vmatmul.f32.gmra.mxu1 %v399_v29  ;;  %509 = vmatmul.f32.gmra.mxu2 %v403_v30 }
  0x50   : > { %536 = vmatmul.f32.gmra.mxu3 %v412_v31 }
  0x55   : > { %464 = vmatmul.f32.gmra.mxu0 %v388_v32 }
  0x56   : > { %512 = vmatmul.f32.gmra.mxu2 %v404_v33 }
  0x58   : > { %539 = vmatmul.f32.gmra.mxu3 %v413_v34 }
  0x5d   : > { %467 = vmatmul.f32.gmra.mxu0 %v389_v35 }
  0x5e   : > { %515 = vmatmul.f32.gmra.mxu2 %v405_v36 }
  0x60   : > { %542 = vmatmul.f32.gmra.mxu3 %v414_v37 }
  0x65   : > { %470 = vmatmul.f32.gmra.mxu0 %v390_v38 }
  0x66   : > { %518 = vmatmul.f32.gmra.mxu2 %v406_v39 }
  0x68   : > { %545 = vmatmul.f32.gmra.mxu3 %v415_v40 }
  0x6d   : > { %473 = vmatmul.f32.gmra.mxu0 %v391_v41 }
  0x6e   : > { %521 = vmatmul.f32.gmra.mxu2 %v407_v42 }
  0x75   : > { %476 = vmatmul.f32.gmra.mxu0 %v392_v43 }
  0x76   : > { %524 = vmatmul.f32.gmra.mxu2 %v408_v44 }
  0x7d   : > { %479 = vmatmul.f32.gmra.mxu0 %v393_v45 }
  0x85   : > { %482 = vmatmul.f32.gmra.mxu0 %v394_v46 }
  0x8d   : > { %485 = vmatmul.f32.gmra.mxu0 %v395_v47 }
  0xb2   : > { %v453_v49 = vpop.f32.mrf.mxu0 }
  0xb3   : > { %v454_v50 = vadd.f32 %v2431_v48, %v453_v49  ;;  %v489_v51 = vpop.f32.mrf.mxu1 }
  0xb4   : > { %v490_v52 = vadd.f32 %v2431_v48, %v489_v51 }
  0xb5   : > { %v549_v53 = vmax.f32 %v454_v50, 0.0 }
  0xb6   : > { %v561_v54 = vmax.f32 %v490_v52, 0.0 }
  0xb7   : > { %v613_v55 = vrot.slane %v549_v53, 4  ;;  %v678_v56 = vsel %vm677_vm0, %v549_v53, -inf }
  0xb8   : > { %v679_v57 = vrot.slane %v678_v56, 4  ;;  %v625_v58 = vrot.slane %v561_v54, 4  ;;  %v846_v59 = vsel %vm677_vm0, %v561_v54, -inf }
  0xb9   : > { %v685_v60 = vsel %vm677_vm0, %v613_v55, -inf  ;;  %v847_v61 = vrot.slane %v846_v59, 4  ;;  %v501_v62 = vpop.f32.mrf.mxu2 }
  0xba   : > { %v680_v63 = vmax.f32 %v678_v56, %v679_v57  ;;  %v686_v0 = vrot.slane %v685_v60, 4  ;;  %v853_v1 = vsel %vm677_vm0, %v625_v58, -inf  ;;  %v502_v2 = vadd.f32 %v2431_v48, %v501_v62  ;;  %v456_v3 = vpop.f32.mrf.mxu0 }
  0xbb   : > { %v848_v4 = vmax.f32 %v846_v59, %v847_v61  ;;  %v854_v5 = vrot.slane %v853_v1, 4  ;;  %v457_v6 = vadd.f32 %v2431_v48, %v456_v3  ;;  %v492_v10 = vpop.f32.mrf.mxu1 }
  0xbc   : > { %v681_v7 = vrot.slane %v680_v63, 2  ;;  %v687_v8 = vmax.f32 %v685_v60, %v686_v0  ;;  %v565_v9 = vmax.f32 %v502_v2, 0.0  ;;  %v493_v14 = vadd.f32 %v2431_v48, %v492_v10 }
  0xbd   : > { %v849_v11 = vrot.slane %v848_v4, 2  ;;  %v855_v12 = vmax.f32 %v853_v1, %v854_v5  ;;  %v550_v13 = vmax.f32 %v457_v6, 0.0 }
  0xbe   : > { %v682_v15 = vmax.f32 %v680_v63, %v681_v7  ;;  %v688_v16 = vrot.slane %v687_v8, 2  ;;  %v629_v17 = vrot.slane %v565_v9, 4  ;;  %v902_v18 = vsel %vm677_vm0, %v565_v9, -inf }
  0xbf   : > { %v850_v19 = vmax.f32 %v848_v4, %v849_v11  ;;  %v856_v20 = vrot.slane %v855_v12, 2  ;;  %v903_v21 = vrot.slane %v902_v18, 4  ;;  %v614_v22 = vrot.slane %v550_v13, 4 }
  0xc0   : > { %v683_v23 = vrot.slane %v682_v15, 1  ;;  %v689_v24 = vmax.f32 %v687_v8, %v688_v16  ;;  %v909_v25 = vsel %vm677_vm0, %v629_v17, -inf  ;;  %v692_v26 = vsel %vm677_vm0, %v550_v13, -inf }
  0xc1   : > { %v857_v27 = vmax.f32 %v855_v12, %v856_v20  ;;  %v904_v28 = vmax.f32 %v902_v18, %v903_v21  ;;  %v910_v29 = vrot.slane %v909_v25, 4  ;;  %v851_v31 = vrot.slane %v850_v19, 1  ;;  %v504_v42 = vpop.f32.mrf.mxu2 }
  0xc2   : > { %v690_v30 = vrot.slane %v689_v24, 1  ;;  %v693_v32 = vrot.slane %v692_v26, 4  ;;  %v699_v33 = vsel %vm677_vm0, %v614_v22, -inf  ;;  %v684_v34 = vmax.f32 %v682_v15, %v683_v23  ;;  %v459_v45 = vpop.f32.mrf.mxu0 }
  0xc3   : > { %v858_v35 = vrot.slane %v857_v27, 1  ;;  %v905_v36 = vrot.slane %v904_v28, 2  ;;  %v911_v37 = vmax.f32 %v909_v25, %v910_v29  ;;  %v700_v40 = vrot.slane %v699_v33, 4 }
  0xc4   : > { %v2446_v38 = vmax.f32 %v689_v24, %v690_v30  ;;  %v694_v39 = vmax.f32 %v692_v26, %v693_v32  ;;  %v562_v41 = vmax.f32 %v493_v14, 0.0  ;;  %v505_v44 = vadd.f32 %v2431_v48, %v504_v42 }
  0xc5   : > { %v912_v43 = vrot.slane %v911_v37, 2  ;;  %v2451_v47 = vmax.f32 %v850_v19, %v851_v31  ;;  %v701_v50 = vmax.f32 %v699_v33, %v700_v40  ;;  %v2457_v52 = vmax.f32 %v857_v27, %v858_v35  ;;  %v495_v19 = vpop.f32.mrf.mxu1 }
  0xc6   : > { %v1203_v46 = vsel %vm1202_vm1, %v2446_v38, %v684_v34  ;;  %v695_v49 = vrot.slane %v694_v39, 2  ;;  %v2455_v51 = vsel %vm1214_vm2, %v2446_v38, %v684_v34  ;;  %v2459_v53 = vmax.f32 %v904_v28, %v905_v36 }
  0xc7   : > { %3577 = vst [vmem:[#allocation5_spill] sm:$0xff] %v2451_v47  ;;  %v626_v54 = vrot.slane %v562_v41, 4  ;;  %v702_v56 = vrot.slane %v701_v50, 2  ;;  %v860_v57 = vsel %vm677_vm0, %v562_v41, -inf  ;;  %v566_v58 = vmax.f32 %v505_v44, 0.0 }
  0xc8   : > { %3578 = vst [vmem:[#allocation6_spill] sm:$0xff] %v2457_v52  ;;  %v696_v55 = vmax.f32 %v694_v39, %v695_v49  ;;  %v913_v59 = vmax.f32 %v911_v37, %v912_v43  ;;  %v861_v60 = vrot.slane %v860_v57, 4  ;;  %v460_v62 = vadd.f32 %v2431_v48, %v459_v45 }
  0xc9   : > { %v867_v61 = vsel %vm677_vm0, %v626_v54, -inf  ;;  %v703_v0 = vmax.f32 %v701_v50, %v702_v56  ;;  %v630_v2 = vrot.slane %v566_v58, 4  ;;  %v1354_v3 = vsel %vm1214_vm2, %v2457_v52, %v2451_v47  ;;  %v507_v24 = vpop.f32.mrf.mxu2 }
  0xca   : > { %v697_v63 = vrot.slane %v696_v55, 1  ;;  %v868_v1 = vrot.slane %v867_v61, 4  ;;  %v862_v4 = vmax.f32 %v860_v57, %v861_v60  ;;  %v916_v5 = vsel %vm677_vm0, %v566_v58, -inf  ;;  %v462_v25 = vpop.f32.mrf.mxu0 }
  0xcb   : > { %v551_v6 = vmax.f32 %v460_v62, 0.0  ;;  %v917_v10 = vrot.slane %v916_v5, 4  ;;  %v923_v12 = vsel %vm677_vm0, %v630_v2, -inf  ;;  %v914_v15 = vrot.slane %v913_v59, 1 }
  0xcc   : > { %v2469_v8 = vmax.f32 %v696_v55, %v697_v63  ;;  %v869_v9 = vmax.f32 %v867_v61, %v868_v1  ;;  %v863_v11 = vrot.slane %v862_v4, 2  ;;  %v704_v16 = vrot.slane %v703_v0, 1 }
  0xcd   : > { %v615_v13 = vrot.slane %v551_v6, 4  ;;  %v706_v14 = vsel %vm677_vm0, %v551_v6, -inf  ;;  %v918_v21 = vmax.f32 %v916_v5, %v917_v10  ;;  %v924_v22 = vrot.slane %v923_v12, 4 }
  0xce   : > { %v2475_v17 = vsel %vm1204_vm3, %v2469_v8, %v1203_v46  ;;  %v870_v18 = vrot.slane %v869_v9, 2  ;;  %v864_v20 = vmax.f32 %v862_v4, %v863_v11  ;;  %v707_v23 = vrot.slane %v706_v14, 4  ;;  %v498_v4 = vpop.f32.mrf.mxu1 }
  0xcf   : > { %3579 = vst [vmem:[#allocation7_spill] sm:$0xff] %v2475_v17  ;;  %v713_v27 = vsel %vm677_vm0, %v615_v13, -inf  ;;  %v496_v28 = vadd.f32 %v2431_v48, %v495_v19  ;;  %v508_v29 = vadd.f32 %v2431_v48, %v507_v24  ;;  %v919_v31 = vrot.slane %v918_v21, 2 }
  0xd0   : > { %v871_v26 = vmax.f32 %v869_v9, %v870_v18  ;;  %v865_v30 = vrot.slane %v864_v20, 1  ;;  %v925_v32 = vmax.f32 %v923_v12, %v924_v22  ;;  %v708_v33 = vmax.f32 %v706_v14, %v707_v23 }
  0xd1   : > { %v2480_v34 = vmax.f32 %v913_v59, %v914_v15  ;;  %v714_v36 = vrot.slane %v713_v27, 4  ;;  %v563_v37 = vmax.f32 %v496_v28, 0.0  ;;  %v920_v39 = vmax.f32 %v918_v21, %v919_v31  ;;  %v510_v11 = vpop.f32.mrf.mxu2 }
  0xd2   : > { %v872_v35 = vrot.slane %v871_v26, 1  ;;  %v926_v40 = vrot.slane %v925_v32, 2  ;;  %v709_v41 = vrot.slane %v708_v33, 2  ;;  %v567_v42 = vmax.f32 %v508_v29, 0.0  ;;  %v465_v12 = vpop.f32.mrf.mxu0 }
  0xd3   : > { %v2482_v43 = vmax.f32 %v864_v20, %v865_v30  ;;  %v715_v44 = vmax.f32 %v713_v27, %v714_v36  ;;  %v627_v45 = vrot.slane %v563_v37, 4  ;;  %v874_v46 = vsel %vm677_vm0, %v563_v37, -inf }
  0xd4   : > { %v2485_v49 = vmax.f32 %v703_v0, %v704_v16  ;;  %v2490_v50 = vsel %vm1214_vm2, %v2469_v8, %v2446_v38  ;;  %v921_v54 = vrot.slane %v920_v39, 1  ;;  %v927_v55 = vmax.f32 %v925_v32, %v926_v40 }
  0xd5   : > { %3580 = vst [vmem:[#allocation8_spill] sm:$0xff] %v2482_v43  ;;  %v710_v56 = vmax.f32 %v708_v33, %v709_v41  ;;  %v716_v57 = vrot.slane %v715_v44, 2  ;;  %v875_v58 = vrot.slane %v874_v46, 4  ;;  %v881_v59 = vsel %vm677_vm0, %v627_v45, -inf }
  0xd6   : > { %3581 = vst [vmem:[#allocation9_spill] sm:$0xff] %v2485_v49  ;;  %v2493_v60 = vmax.f32 %v871_v26, %v872_v35  ;;  %v928_v61 = vrot.slane %v927_v55, 1  ;;  %v882_v62 = vrot.slane %v881_v59, 4  ;;  %v631_v63 = vrot.slane %v567_v42, 4 }
  0xd7   : > { %v2498_v0 = vsel %vm1214_vm2, %v2482_v43, %v2457_v52  ;;  %v2502_v38 = vsel %vm1202_vm1, %v2482_v43, %v1354_v3  ;;  %v876_v1 = vmax.f32 %v874_v46, %v875_v58  ;;  %v930_v2 = vsel %vm677_vm0, %v567_v42, -inf }
  0xd8   : > { %v2505_v5 = vmax.f32 %v920_v39, %v921_v54  ;;  %v711_v6 = vrot.slane %v710_v56, 1  ;;  %v883_v9 = vmax.f32 %v881_v59, %v882_v62  ;;  %v931_v10 = vrot.slane %v930_v2, 4 }
  0xd9   : > { %v2507_v13 = vmax.f32 %v927_v55, %v928_v61  ;;  %v2509_v14 = vmax.f32 %v715_v44, %v716_v57  ;;  %v877_v15 = vrot.slane %v876_v1, 2  ;;  %v937_v16 = vsel %vm677_vm0, %v631_v63, -inf }
  0xda   : > { %v884_v3 = vrot.slane %v883_v9, 2  ;;  %v932_v18 = vmax.f32 %v930_v2, %v931_v10  ;;  %v938_v19 = vrot.slane %v937_v16, 4  ;;  %v463_v20 = vadd.f32 %v2431_v48, %v462_v25 }
  0xdb   : > { %3582 = vst [vmem:[#allocation10_spill] sm:$0xff] %v2507_v13  ;;  %v878_v21 = vmax.f32 %v876_v1, %v877_v15  ;;  %v499_v22 = vadd.f32 %v2431_v48, %v498_v4  ;;  %v511_v23 = vadd.f32 %v2431_v48, %v510_v11  ;;  %v466_v24 = vadd.f32 %v2431_v48, %v465_v12 }
  0xdc   : > { %v885_v26 = vmax.f32 %v883_v9, %v884_v3  ;;  %v933_v27 = vrot.slane %v932_v18, 2  ;;  %v939_v28 = vmax.f32 %v937_v16, %v938_v19  ;;  %v552_v29 = vmax.f32 %v463_v20, 0.0 }
  0xdd   : > { %v2519_v30 = vsel %vm1214_vm2, %v2505_v5, %v2480_v34  ;;  %v2521_v31 = vmax.f32 %v710_v56, %v711_v6  ;;  %v564_v32 = vmax.f32 %v499_v22, 0.0  ;;  %v568_v25 = vmax.f32 %v511_v23, 0.0 }
  0xde   : > { %v879_v33 = vrot.slane %v878_v21, 1  ;;  %v934_v35 = vmax.f32 %v932_v18, %v933_v27  ;;  %v940_v36 = vrot.slane %v939_v28, 2  ;;  %v616_v37 = vrot.slane %v552_v29, 4 }
  0xdf   : > { %3583 = vst [vmem:[#allocation11_spill] sm:$0xff] %v2521_v31  ;;  %v718_v39 = vrot.slane %v2509_v14, 1  ;;  %v720_v40 = vsel %vm677_vm0, %v552_v29, -inf  ;;  %v628_v41 = vrot.slane %v564_v32, 4  ;;  %v888_v42 = vsel %vm677_vm0, %v564_v32, -inf  ;;  %v513_v29 = vpop.f32.mrf.mxu2 }
  0xe0   : > { %v886_v44 = vrot.slane %v885_v26, 1  ;;  %v941_v45 = vmax.f32 %v939_v28, %v940_v36  ;;  %v721_v46 = vrot.slane %v720_v40, 4  ;;  %v553_v54 = vmax.f32 %v466_v24, 0.0  ;;  %v528_v28 = vpop.f32.mrf.mxu3 }
  0xe1   : > { %v727_v55 = vsel %vm677_vm0, %v616_v37, -inf  ;;  %v889_v56 = vrot.slane %v888_v42, 4  ;;  %v895_v57 = vsel %vm677_vm0, %v628_v41, -inf  ;;  %v632_v58 = vrot.slane %v568_v25, 4 }
  0xe2   : > { %v2528_v59 = vmax.f32 %v878_v21, %v879_v33  ;;  %v935_v61 = vrot.slane %v934_v35, 1  ;;  %v722_v62 = vmax.f32 %v720_v40, %v721_v46  ;;  %v728_v63 = vrot.slane %v727_v55, 4 }
  0xe3   : > { %v890_v1 = vmax.f32 %v888_v42, %v889_v56  ;;  %v896_v2 = vrot.slane %v895_v57, 4  ;;  %v944_v4 = vsel %vm677_vm0, %v568_v25, -inf  ;;  %v951_v6 = vsel %vm677_vm0, %v632_v58, -inf }
  0xe4   : > { %v2532_v9 = vmax.f32 %v885_v26, %v886_v44  ;;  %v942_v10 = vrot.slane %v941_v45, 1  ;;  %v723_v11 = vrot.slane %v722_v62, 2  ;;  %v945_v12 = vrot.slane %v944_v4, 4 }
  0xe5   : > { %v891_v15 = vrot.slane %v890_v1, 2  ;;  %v897_v16 = vmax.f32 %v895_v57, %v896_v2  ;;  %v952_v3 = vrot.slane %v951_v6, 4  ;;  %v617_v18 = vrot.slane %v553_v54, 4 }
  0xe6   : > { %v2534_v19 = vmax.f32 %v934_v35, %v935_v61  ;;  %v2536_v20 = vmax.f32 %v727_v55, %v728_v63  ;;  %v946_v21 = vmax.f32 %v944_v4, %v945_v12  ;;  %v734_v22 = vsel %vm677_vm0, %v553_v54, -inf  ;;  %v468_v35 = vpop.f32.mrf.mxu0 }
  0xe7   : > { %v2539_v23 = vmax.f32 %v722_v62, %v723_v11  ;;  %v892_v24 = vmax.f32 %v890_v1, %v891_v15  ;;  %v953_v27 = vmax.f32 %v951_v6, %v952_v3  ;;  %v735_v26 = vrot.slane %v734_v22, 4 }
  0xe8   : > { %3584 = vst [vmem:[#allocation12_spill] sm:$0xff] %v2534_v19  ;;  %v898_v32 = vrot.slane %v897_v16, 2  ;;  %v947_v25 = vrot.slane %v946_v21, 2  ;;  %v741_v33 = vsel %vm677_vm0, %v617_v18, -inf  ;;  %v529_v36 = vadd.f32 %v2431_v48, %v528_v28 }
  0xe9   : > { %v2543_v37 = vmax.f32 %v941_v45, %v942_v10  ;;  %v893_v40 = vrot.slane %v892_v24, 1  ;;  %v954_v41 = vrot.slane %v953_v27, 2  ;;  %v736_v42 = vmax.f32 %v734_v22, %v735_v26 }
  0xea   : > { %v948_v44 = vmax.f32 %v946_v21, %v947_v25  ;;  %v742_v46 = vrot.slane %v741_v33, 4  ;;  %v574_v54 = vmax.f32 %v529_v36, 0.0  ;;  %v514_v55 = vadd.f32 %v2431_v48, %v513_v29 }
  0xeb   : > { %3585 = vst [vmem:[#allocation13_spill] sm:$0xff] %v2543_v37  ;;  %v725_v56 = vrot.slane %v2539_v23, 1  ;;  %v730_v57 = vrot.slane %v2536_v20, 2  ;;  %v2548_v58 = vmax.f32 %v953_v27, %v954_v41  ;;  %v469_v61 = vadd.f32 %v2431_v48, %v468_v35 }
  0xec   : > { %v2551_v62 = vmax.f32 %v897_v16, %v898_v32  ;;  %v743_v45 = vmax.f32 %v741_v33, %v742_v46  ;;  %v638_v63 = vrot.slane %v574_v54, 4  ;;  %v1028_v1 = vsel %vm677_vm0, %v574_v54, -inf }
  0xed   : > { %v2554_v2 = vmax.f32 %v892_v24, %v893_v40  ;;  %v737_v4 = vrot.slane %v736_v42, 2  ;;  %v1029_v6 = vrot.slane %v1028_v1, 4  ;;  %v569_v10 = vmax.f32 %v514_v55, 0.0 }
  0xee   : > { %v949_v11 = vrot.slane %v948_v44, 1  ;;  %v744_v12 = vrot.slane %v743_v45, 2  ;;  %v1035_v15 = vsel %vm677_vm0, %v638_v63, -inf  ;;  %v554_v3 = vmax.f32 %v469_v61, 0.0 }
  0xef   : > { %v1030_v21 = vmax.f32 %v1028_v1, %v1029_v6  ;;  %v1036_v22 = vrot.slane %v1035_v15, 4  ;;  %v633_v16 = vrot.slane %v569_v10, 4  ;;  %v958_v26 = vsel %vm677_vm0, %v569_v10, -inf }
  0xf0   : > { %v745_v27 = vmax.f32 %v743_v45, %v744_v12  ;;  %v618_v28 = vrot.slane %v554_v3, 4  ;;  %v748_v24 = vsel %vm677_vm0, %v554_v3, -inf  ;;  %v959_v25 = vrot.slane %v958_v26, 4  ;;  %v531_v45 = vpop.f32.mrf.mxu3 }
  0xf1   : > { %v1031_v29 = vrot.slane %v1030_v21, 2  ;;  %v1037_v32 = vmax.f32 %v1035_v15, %v1036_v22  ;;  %v965_v33 = vsel %vm677_vm0, %v633_v16, -inf  ;;  %v2561_v36 = vmax.f32 %v736_v42, %v737_v4 }
  0xf2   : > { %v966_v35 = vrot.slane %v965_v33, 4  ;;  %v749_v40 = vrot.slane %v748_v24, 4  ;;  %v755_v41 = vsel %vm677_vm0, %v618_v28, -inf  ;;  %v960_v55 = vmax.f32 %v958_v26, %v959_v25 }
  0xf3   : > { %v1032_v46 = vmax.f32 %v1030_v21, %v1031_v29  ;;  %v1038_v54 = vrot.slane %v1037_v32, 2  ;;  %v756_v61 = vrot.slane %v755_v41, 4  ;;  %v2564_v63 = vmax.f32 %v948_v44, %v949_v11 }
  0xf4   : > { %v967_v1 = vmax.f32 %v965_v33, %v966_v35  ;;  %v750_v6 = vmax.f32 %v748_v24, %v749_v40  ;;  %v532_v10 = vadd.f32 %v2431_v48, %v531_v45  ;;  %v746_v12 = vrot.slane %v745_v27, 1 }
  0xf5   : > { %3586 = vst [vmem:[#allocation14_spill] sm:$0xff] %v2564_v63  ;;  %v1039_v15 = vmax.f32 %v1037_v32, %v1038_v54  ;;  %v961_v3 = vrot.slane %v960_v55, 2  ;;  %v757_v42 = vmax.f32 %v755_v41, %v756_v61  ;;  %v1033_v4 = vrot.slane %v1032_v46, 1 }
  0xf6   : > { %v968_v22 = vrot.slane %v967_v1, 2  ;;  %v751_v16 = vrot.slane %v750_v6, 2  ;;  %v575_v7 = vmax.f32 %v532_v10, 0.0  ;;  %v739_v21 = vrot.slane %v2561_v36, 1 }
  0xf7   : > { %v1040_v28 = vrot.slane %v1039_v15, 1  ;;  %v2568_v26 = vmax.f32 %v960_v55, %v961_v3  ;;  %v758_v29 = vrot.slane %v757_v42, 2  ;;  %v2571_v33 = vmax.f32 %v745_v27, %v746_v12 }
  0xf8   : > { %v969_v44 = vmax.f32 %v967_v1, %v968_v22  ;;  %v752_v11 = vmax.f32 %v750_v6, %v751_v16  ;;  %v639_v25 = vrot.slane %v575_v7, 4  ;;  %v1042_v24 = vsel %vm677_vm0, %v575_v7, -inf  ;;  %v471_v22 = vpop.f32.mrf.mxu0 }
  0xf9   : > { %v759_v32 = vmax.f32 %v757_v42, %v758_v29  ;;  %v1043_v35 = vrot.slane %v1042_v24, 4  ;;  %v2576_v40 = vmax.f32 %v2509_v14, %v718_v39  ;;  %v2578_v41 = vmax.f32 %v1032_v46, %v1033_v4  ;;  %v516_v4 = vpop.f32.mrf.mxu2 }
  0xfa   : > { %v970_v54 = vrot.slane %v969_v44, 1  ;;  %v753_v55 = vrot.slane %v752_v11, 1  ;;  %v1049_v61 = vsel %vm677_vm0, %v639_v25, -inf  ;;  %v731_v7 = vmax.f32 %v2536_v20, %v730_v57 }
  0xfb   : > { %3587 = vst [vmem:[#allocation15_spill] sm:$0xff] %v2576_v40  ;;  %v760_v45 = vrot.slane %v759_v32, 1  ;;  %v1044_v1 = vmax.f32 %v1042_v24, %v1043_v35  ;;  %v1050_v6 = vrot.slane %v1049_v61, 4  ;;  %v2584_v27 = vmax.f32 %v1039_v15, %v1040_v28 }
  0xfc   : > { %v2587_v12 = vmax.f32 %v969_v44, %v970_v54  ;;  %v2592_v14 = vmax.f32 %v2539_v23, %v725_v56  ;;  %v2594_v39 = vmax.f32 %v752_v11, %v753_v55  ;;  %v732_v42 = vrot.slane %v731_v7, 1  ;;  %v534_v56 = vpop.f32.mrf.mxu3 }
  0xfd   : > { %v1045_v46 = vrot.slane %v1044_v1, 2  ;;  %v1051_v3 = vmax.f32 %v1049_v61, %v1050_v6  ;;  %v2596_v16 = vmax.f32 %v759_v32, %v760_v45  ;;  %v1334_v20 = vsel %vm1202_vm1, %v2469_v8, %v2455_v51 }
  0xfe   : > { %3588 = vst [vmem:[#allocation16_spill] sm:$0xff] %v2587_v12  ;;  %v2601_v15 = vmax.f32 %v731_v7, %v732_v42  ;;  %v1335_v23 = vsel %vm1204_vm3, %v2485_v49, %v1334_v20  ;;  %v517_v29 = vadd.f32 %v2431_v48, %v516_v4  ;;  %v472_v44 = vadd.f32 %v2431_v48, %v471_v22 }
  0xff   : > { %3589 = vst [vmem:[#allocation17_spill] sm:$0xff] %v2592_v14  ;;  %v1052_v57 = vrot.slane %v1051_v3, 2  ;;  %v1336_v28 = vsel %vm1206_vm4, %v2521_v31, %v1335_v23  ;;  %v535_v11 = vadd.f32 %v2431_v48, %v534_v56  ;;  %v1046_v25 = vmax.f32 %v1044_v1, %v1045_v46 }
 0x100   : > { %v1337_v51 = vsel %vm1208_vm5, %v2576_v40, %v1336_v28  ;;  %v2613_v8 = vmax.f32 %v2561_v36, %v739_v21  ;;  %v570_v32 = vmax.f32 %v517_v29, 0.0  ;;  %v555_v35 = vmax.f32 %v472_v44, 0.0 }
 0x101   : > { %v1338_v24 = vsel %vm1210_vm6, %v2592_v14, %v1337_v51  ;;  %v576_v54 = vmax.f32 %v535_v11, 0.0  ;;  %v2620_v55 = vsel %vm1214_vm2, %v2594_v39, %v2571_v33  ;;  %v1053_v61 = vmax.f32 %v1051_v3, %v1052_v57  ;;  %v519_v11 = vpop.f32.mrf.mxu2 }
 0x102   : > { %v1339_v45 = vsel %vm1212_vm7, %v2601_v15, %v1338_v24  ;;  %v1215_v36 = vsel %vm1214_vm2, %v2613_v8, %v2601_v15  ;;  %v634_v21 = vrot.slane %v570_v32, 4  ;;  %v972_v1 = vsel %vm677_vm0, %v570_v32, -inf }
 0x103   : > { %1389 = vrot.lane.b32.xlu0 %v1339_v45, %s2231_s25  ;;  %v619_v6 = vrot.slane %v555_v35, 4  ;;  %v762_v7 = vsel %vm677_vm0, %v555_v35, -inf  ;;  %v1047_v46 = vrot.slane %v1046_v25, 1  ;;  %v973_v42 = vrot.slane %v972_v1, 4 }
 0x104   : > { %v763_v4 = vrot.slane %v762_v7, 4  ;;  %v640_v3 = vrot.slane %v576_v54, 4  ;;  %v979_v22 = vsel %vm677_vm0, %v634_v21, -inf  ;;  %v1056_v57 = vsel %vm677_vm0, %v576_v54, -inf }
 0x105   : > { %v769_v20 = vsel %vm677_vm0, %v619_v6, -inf  ;;  %v2635_v23 = vsel %vm1202_vm1, %v2571_v33, %v1215_v36  ;;  %v974_v56 = vmax.f32 %v972_v1, %v973_v42  ;;  %v980_v28 = vrot.slane %v979_v22, 4 }
 0x106   : > { %3590 = vst [vmem:[#allocation18_spill] sm:$0xff] %v2635_v23  ;;  %v764_v29 = vmax.f32 %v762_v7, %v763_v4  ;;  %v770_v44 = vrot.slane %v769_v20, 4  ;;  %v1054_v51 = vrot.slane %v1053_v61, 1  ;;  %v1057_v24 = vrot.slane %v1056_v57, 4 }
 0x107   : > { %v1063_v32 = vsel %vm677_vm0, %v640_v3, -inf  ;;  %v1276_v35 = vsel %vm1202_vm1, %v2485_v49, %v2490_v50  ;;  %v975_v45 = vrot.slane %v974_v56, 2  ;;  %v981_v21 = vmax.f32 %v979_v22, %v980_v28 }
 0x108   : > { %v765_v54 = vrot.slane %v764_v29, 2  ;;  %v771_v6 = vmax.f32 %v769_v20, %v770_v44  ;;  %v1058_v10 = vmax.f32 %v1056_v57, %v1057_v24  ;;  %v1064_v36 = vrot.slane %v1063_v32, 4 }
 0x109   : > { %v1277_v1 = vsel %vm1204_vm3, %v2521_v31, %v1276_v35  ;;  %v520_v7 = vadd.f32 %v2431_v48, %v519_v11  ;;  %v976_v42 = vmax.f32 %v974_v56, %v975_v45  ;;  %v982_v4 = vrot.slane %v981_v21, 2 }
 0x10a   : > { %v766_v18 = vmax.f32 %v764_v29, %v765_v54  ;;  %v772_v43 = vrot.slane %v771_v6, 2  ;;  %v1059_v3 = vrot.slane %v1058_v10, 2  ;;  %v1065_v52 = vmax.f32 %v1063_v32, %v1064_v36  ;;  %v537_v36 = vpop.f32.mrf.mxu3 }
 0x10b   : > { %v1278_v50 = vsel %vm1206_vm4, %v2576_v40, %v1277_v1  ;;  %v571_v49 = vmax.f32 %v520_v7, 0.0  ;;  %v977_v22 = vrot.slane %v976_v42, 1  ;;  %v983_v28 = vmax.f32 %v981_v21, %v982_v4 }
 0x10c   : > { %v767_v20 = vrot.slane %v766_v18, 1  ;;  %v2646_v57 = vmax.f32 %v771_v6, %v772_v43  ;;  %v2648_v44 = vmax.f32 %v1058_v10, %v1059_v3  ;;  %v1066_v24 = vrot.slane %v1065_v52, 2  ;;  %v474_v43 = vpop.f32.mrf.mxu0 }
 0x10d   : > { %v1279_v56 = vsel %vm1208_vm5, %v2592_v14, %v1278_v50  ;;  %v635_v11 = vrot.slane %v571_v49, 4  ;;  %v2652_v29 = vmax.f32 %v1046_v25, %v1047_v46  ;;  %v2654_v35 = vmax.f32 %v1053_v61, %v1054_v51 }
 0x10e   : > { %v2656_v32 = vmax.f32 %v976_v42, %v977_v22  ;;  %v2661_v45 = vsel %vm1214_vm2, %v2571_v33, %v2613_v8  ;;  %v984_v21 = vrot.slane %v983_v28, 1  ;;  %v2663_v10 = vmax.f32 %v766_v18, %v767_v20  ;;  %v522_v33 = vpop.f32.mrf.mxu2 }
 0x10f   : > { %v1280_v54 = vsel %vm1210_vm6, %v2601_v15, %v1279_v56  ;;  %v986_v6 = vsel %vm677_vm0, %v571_v49, -inf  ;;  %v1061_v61 = vrot.slane %v2648_v44, 1  ;;  %v2672_v1 = vmax.f32 %v1065_v52, %v1066_v24 }
 0x110   : > { %v1281_v46 = vsel %vm1212_vm7, %v2613_v8, %v1280_v54  ;;  %v987_v51 = vrot.slane %v986_v6, 4  ;;  %v993_v18 = vsel %vm677_vm0, %v635_v11, -inf  ;;  %v475_v15 = vadd.f32 %v2431_v48, %v474_v43 }
 0x111   : > { %1414 = vrot.lane.b32.xlu0 %v1281_v46, %s3572_s29  ;;  %v538_v49 = vadd.f32 %v2431_v48, %v537_v36  ;;  %v994_v42 = vrot.slane %v993_v18, 4  ;;  %v900_v4 = vrot.slane %v2551_v62, 1  ;;  %v1356_v8 = vsel %vm1204_vm3, %v2493_v60, %v2502_v38 }
 0x112   : > { %v988_v7 = vmax.f32 %v986_v6, %v987_v51  ;;  %v556_v3 = vmax.f32 %v475_v15, 0.0  ;;  %v1357_v50 = vsel %vm1206_vm4, %v2528_v59, %v1356_v8  ;;  %v523_v22 = vadd.f32 %v2431_v48, %v522_v33 }
 0x113   : > { %v577_v52 = vmax.f32 %v538_v49, 0.0  ;;  %v995_v24 = vmax.f32 %v993_v18, %v994_v42  ;;  %v2686_v56 = vmax.f32 %v2551_v62, %v900_v4  ;;  %v1358_v11 = vsel %vm1208_vm5, %v2532_v9, %v1357_v50 }
 0x114   : > { %v989_v20 = vrot.slane %v988_v7, 2  ;;  %v620_v43 = vrot.slane %v556_v3, 4  ;;  %v776_v54 = vsel %vm677_vm0, %v556_v3, -inf  ;;  %v1359_v62 = vsel %vm1210_vm6, %v2554_v2, %v1358_v11  ;;  %v477_v11 = vpop.f32.mrf.mxu0 }
 0x115   : > { %v641_v6 = vrot.slane %v577_v52, 4  ;;  %v1070_v38 = vsel %vm677_vm0, %v577_v52, -inf  ;;  %v996_v51 = vrot.slane %v995_v24, 2  ;;  %v777_v36 = vrot.slane %v776_v54, 4 }
 0x116   : > { %v990_v46 = vmax.f32 %v988_v7, %v989_v20  ;;  %v1071_v15 = vrot.slane %v1070_v38, 4  ;;  %v783_v33 = vsel %vm677_vm0, %v620_v43, -inf  ;;  %v572_v49 = vmax.f32 %v523_v22, 0.0 }
 0x117   : > { %v1077_v18 = vsel %vm677_vm0, %v641_v6, -inf  ;;  %v997_v4 = vmax.f32 %v995_v24, %v996_v51  ;;  %v778_v8 = vmax.f32 %v776_v54, %v777_v36  ;;  %v784_v50 = vrot.slane %v783_v33, 4 }
 0x118   : > { %v991_v42 = vrot.slane %v990_v46, 1  ;;  %v1072_v3 = vmax.f32 %v1070_v38, %v1071_v15  ;;  %v1078_v25 = vrot.slane %v1077_v18, 4  ;;  %v1360_v7 = vsel %vm1212_vm7, %v2686_v56, %v1359_v62 }
 0x119   : > { %v636_v52 = vrot.slane %v572_v49, 4  ;;  %v2698_v20 = vmax.f32 %v983_v28, %v984_v21  ;;  %v998_v14 = vrot.slane %v997_v4, 1  ;;  %v779_v43 = vrot.slane %v778_v8, 2  ;;  %1395 = vrot.lane.b32.xlu0 %v1360_v7, %s2231_s25 }
 0x11a   : > { %v2700_v40 = vmax.f32 %v783_v33, %v784_v50  ;;  %v1073_v22 = vrot.slane %v1072_v3, 2  ;;  %v1079_v6 = vmax.f32 %v1077_v18, %v1078_v25  ;;  %v1000_v24 = vsel %vm677_vm0, %v572_v49, -inf  ;;  %v540_v50 = vpop.f32.mrf.mxu3 }
 0x11b   : > { %v1007_v54 = vsel %vm677_vm0, %v636_v52, -inf  ;;  %v2706_v38 = vmax.f32 %v2648_v44, %v1061_v61  ;;  %v2708_v51 = vmax.f32 %v990_v46, %v991_v42  ;;  %v2710_v28 = vmax.f32 %v778_v8, %v779_v43 }
 0x11c   : > { %v1001_v21 = vrot.slane %v1000_v24, 4  ;;  %v2712_v36 = vmax.f32 %v1072_v3, %v1073_v22  ;;  %v1080_v15 = vrot.slane %v1079_v6, 2  ;;  %v1008_v33 = vrot.slane %v1007_v54, 4 }
 0x11d   : > { %v478_v62 = vadd.f32 %v2431_v48, %v477_v11  ;;  %v2715_v25 = vmax.f32 %v997_v4, %v998_v14  ;;  %v541_v44 = vadd.f32 %v2431_v48, %v540_v50  ;;  %v3591_v43 = vrot.slane %v2548_v58, 1 }
 0x11e   : > { %v1002_v49 = vmax.f32 %v1000_v24, %v1001_v21  ;;  %v1081_v46 = vmax.f32 %v1079_v6, %v1080_v15  ;;  %v1009_v42 = vmax.f32 %v1007_v54, %v1008_v33  ;;  %v1304_v24 = vsel %vm1202_vm1, %v2507_v13, %v2519_v30 }
 0x11f   : > { %v557_v8 = vmax.f32 %v478_v62, 0.0  ;;  %v578_v52 = vmax.f32 %v541_v44, 0.0  ;;  %v2724_v11 = vmax.f32 %v2548_v58, %v3591_v43  ;;  %v3593_v58 = vrot.slane %v2568_v26, 1 }
 0x120   : > { %v1003_v7 = vrot.slane %v1002_v49, 2  ;;  %v1082_v14 = vrot.slane %v1081_v46, 1  ;;  %v1010_v33 = vrot.slane %v1009_v42, 2 }
 0x121   : > { %3592 = vst [vmem:[#allocation19_spill] sm:$0xff] %v2724_v11  ;;  %v621_v4 = vrot.slane %v557_v8, 4  ;;  %v790_v22 = vsel %vm677_vm0, %v557_v8, -inf  ;;  %v642_v21 = vrot.slane %v578_v52, 4  ;;  %v1084_v15 = vsel %vm677_vm0, %v578_v52, -inf }
 0x122   : > { %v1004_v6 = vmax.f32 %v1002_v49, %v1003_v7  ;;  %v791_v54 = vrot.slane %v790_v22, 4  ;;  %v1085_v50 = vrot.slane %v1084_v15, 4  ;;  %v964_v44 = vmax.f32 %v2568_v26, %v3593_v58 }
 0x123   : > { %v797_v62 = vsel %vm677_vm0, %v621_v4, -inf  ;;  %v2735_v43 = vmax.f32 %v1081_v46, %v1082_v14  ;;  %v1091_v18 = vsel %vm677_vm0, %v642_v21, -inf  ;;  %v1305_v52 = vsel %vm1204_vm3, %v2534_v19, %v1304_v24  ;;  %v525_v4 = vpop.f32.mrf.mxu2  ;;  %v480_v46 = vpop.f32.mrf.mxu0 }
 0x124   : > { %v792_v8 = vmax.f32 %v790_v22, %v791_v54  ;;  %v798_v3 = vrot.slane %v797_v62, 4  ;;  %v1086_v30 = vmax.f32 %v1084_v15, %v1085_v50  ;;  %v1092_v49 = vrot.slane %v1091_v18, 4 }
 0x125   : > { %v1243_v7 = vsel %vm1214_vm2, %v964_v44, %v2724_v11  ;;  %v1005_v61 = vrot.slane %v1004_v6, 1  ;;  %v2746_v14 = vmax.f32 %v1009_v42, %v1010_v33  ;;  %v1306_v21 = vsel %vm1206_vm4, %v2543_v37, %v1305_v52 }
 0x126   : > { %v793_v31 = vrot.slane %v792_v8, 2  ;;  %v799_v17 = vmax.f32 %v797_v62, %v798_v3  ;;  %v2744_v26 = vsel %vm1202_vm1, %v2587_v12, %v1243_v7  ;;  %v1087_v22 = vrot.slane %v1086_v30, 2 }
 0x127   : > { %3594 = vst [vmem:[#allocation20_spill] sm:$0xff] %v2744_v26  ;;  %v1093_v54 = vmax.f32 %v1091_v18, %v1092_v49  ;;  %v1307_v24 = vsel %vm1208_vm5, %v2564_v63, %v1306_v21  ;;  %v526_v3 = vadd.f32 %v2431_v48, %v525_v4  ;;  %v481_v42 = vadd.f32 %v2431_v48, %v480_v46 }
 0x128   : > { %v2750_v15 = vmax.f32 %v792_v8, %v793_v31  ;;  %v800_v50 = vrot.slane %v799_v17, 2  ;;  %v1088_v62 = vmax.f32 %v1086_v30, %v1087_v22  ;;  %v1308_v7 = vsel %vm1210_vm6, %v2724_v11, %v1307_v24  ;;  %v543_v8 = vpop.f32.mrf.mxu3 }
 0x129   : > { %v1094_v58 = vrot.slane %v1093_v54, 2  ;;  %v2758_v33 = vmax.f32 %v1004_v6, %v1005_v61  ;;  %v1309_v49 = vsel %vm1212_vm7, %v964_v44, %v1308_v7  ;;  %v573_v31 = vmax.f32 %v526_v3, 0.0 }
 0x12a   : > { %v801_v18 = vmax.f32 %v799_v17, %v800_v50  ;;  %v1089_v52 = vrot.slane %v1088_v62, 1  ;;  %1422 = vrot.lane.b32.xlu0 %v1309_v49, %s3572_s29  ;;  %v558_v4 = vmax.f32 %v481_v42, 0.0  ;;  %v544_v30 = vadd.f32 %v2431_v48, %v543_v8 }
 0x12b   : > { %v2761_v26 = vmax.f32 %v1093_v54, %v1094_v58  ;;  %v2767_v21 = vsel %vm1214_vm2, %v2587_v12, %v964_v44  ;;  %v637_v61 = vrot.slane %v573_v31, 4  ;;  %v1014_v17 = vsel %vm677_vm0, %v573_v31, -inf }
 0x12c   : > { %v802_v22 = vrot.slane %v801_v18, 1  ;;  %v1015_v46 = vrot.slane %v1014_v17, 4  ;;  %v622_v50 = vrot.slane %v558_v4, 4  ;;  %v3595_v54 = vrot.slane %v2646_v57, 1 }
 0x12d   : > { %v2776_v3 = vmax.f32 %v1088_v62, %v1089_v52  ;;  %v1021_v48 = vsel %vm677_vm0, %v637_v61, -inf  ;;  %v804_v58 = vsel %vm677_vm0, %v558_v4, -inf  ;;  %v579_v44 = vmax.f32 %v544_v30, 0.0 }
 0x12e   : > { %v2774_v24 = vmax.f32 %v2646_v57, %v3595_v54  ;;  %v2780_v7 = vmax.f32 %v801_v18, %v802_v22  ;;  %v1096_v42 = vrot.slane %v2761_v26, 1  ;;  %v1016_v49 = vmax.f32 %v1014_v17, %v1015_v46 }
 0x12f   : > { %3597 = vst [vmem:[#allocation22_spill] sm:$0xff] %v2776_v3  ;;  %v1022_v31 = vrot.slane %v1021_v48, 4  ;;  %v805_v8 = vrot.slane %v804_v58, 4  ;;  %v811_v6 = vsel %vm677_vm0, %v622_v50, -inf  ;;  %v643_v23 = vrot.slane %v579_v44, 4 }
 0x130   : > { %3596 = vst [vmem:[#allocation21_spill] sm:$0xff] %v2774_v24  ;;  %v1098_v57 = vsel %vm677_vm0, %v579_v44, -inf  ;;  %v1017_v54 = vrot.slane %v1016_v49, 2  ;;  %v812_v52 = vrot.slane %v811_v6, 4  ;;  %v3598_v18 = vrot.slane %v2710_v28, 1 }
 0x131   : > { %v1023_v62 = vmax.f32 %v1021_v48, %v1022_v31  ;;  %v1099_v47 = vrot.slane %v1098_v57, 4  ;;  %v806_v61 = vmax.f32 %v804_v58, %v805_v8  ;;  %v1105_v4 = vsel %vm677_vm0, %v643_v23, -inf }
 0x132   : > { %v2789_v30 = vmax.f32 %v2710_v28, %v3598_v18  ;;  %v3599_v22 = vrot.slane %v2700_v40, 2  ;;  %v1018_v46 = vmax.f32 %v1016_v49, %v1017_v54  ;;  %v813_v12 = vmax.f32 %v811_v6, %v812_v52  ;;  %v483_v18 = vpop.f32.mrf.mxu0 }
 0x133   : > { %v1024_v50 = vrot.slane %v1023_v62, 2  ;;  %v1100_v44 = vmax.f32 %v1098_v57, %v1099_v47  ;;  %v807_v11 = vrot.slane %v806_v61, 2  ;;  %v1106_v48 = vrot.slane %v1105_v4, 4 }
 0x134   : > { %v787_v17 = vmax.f32 %v2700_v40, %v3599_v22  ;;  %v1341_v23 = vsel %vm1202_vm1, %v2594_v39, %v2661_v45  ;;  %v1019_v58 = vrot.slane %v1018_v46, 1  ;;  %v814_v63 = vrot.slane %v813_v12, 2 }
 0x135   : > { %v1025_v8 = vmax.f32 %v1023_v62, %v1024_v50  ;;  %v1101_v28 = vrot.slane %v1100_v44, 2  ;;  %v808_v37 = vmax.f32 %v806_v61, %v807_v11  ;;  %v1107_v19 = vmax.f32 %v1105_v4, %v1106_v48  ;;  %v2166_v62 = vld [vmem:[%s3541_s2] ss:$0 sm:$0xff] }
 0x136   : > { %v788_v31 = vrot.slane %v787_v17, 1  ;;  %v1342_v40 = vsel %vm1204_vm3, %v2596_v16, %v1341_v23  ;;  %v2799_v6 = vmax.f32 %v1018_v46, %v1019_v58  ;;  %v815_v49 = vmax.f32 %v813_v12, %v814_v63 }
 0x137   : > { %v1026_v47 = vrot.slane %v1025_v8, 1  ;;  %v1102_v57 = vmax.f32 %v1100_v44, %v1101_v28  ;;  %v809_v54 = vrot.slane %v808_v37, 1  ;;  %v1108_v52 = vrot.slane %v1107_v19, 2  ;;  %v546_v44 = vpop.f32.mrf.mxu3 }
 0x138   : > { %v789_v13 = vmax.f32 %v787_v17, %v788_v31  ;;  %v1343_v45 = vsel %vm1206_vm4, %v2663_v10, %v1342_v40  ;;  %v484_v11 = vadd.f32 %v2166_v62, %v483_v18  ;;  %v816_v4 = vrot.slane %v815_v49, 1 }
 0x139   : > { %v2806_v61 = vmax.f32 %v1025_v8, %v1026_v47  ;;  %v1103_v22 = vrot.slane %v1102_v57, 1  ;;  %v1344_v17 = vsel %vm1208_vm5, %v2774_v24, %v1343_v45  ;;  %v2811_v63 = vmax.f32 %v2761_v26, %v1096_v42 }
 0x13a   : > { %v2813_v12 = vmax.f32 %v808_v37, %v809_v54  ;;  %v1345_v46 = vsel %vm1210_vm6, %v2789_v30, %v1344_v17  ;;  %v559_v50 = vmax.f32 %v484_v11, 0.0  ;;  %v2820_v48 = vsel %vm1214_vm2, %v2776_v3, %v2735_v43 }
 0x13b   : > { %v2825_v31 = vsel %vm1214_vm2, %v2578_v41, %v2806_v61  ;;  %v1375_v37 = vsel %vm1214_vm2, %v2806_v61, %v2799_v6  ;;  %v1109_v26 = vmax.f32 %v1107_v19, %v1108_v52  ;;  %v2830_v42 = vmax.f32 %v815_v49, %v816_v4 }
 0x13c   : > { %v2832_v23 = vmax.f32 %v1102_v57, %v1103_v22  ;;  %v1346_v58 = vsel %vm1212_vm7, %v789_v13, %v1345_v46  ;;  %v623_v8 = vrot.slane %v559_v50, 4  ;;  %v818_v28 = vsel %vm677_vm0, %v559_v50, -inf  ;;  %v486_v22 = vpop.f32.mrf.mxu0 }
 0x13d   : > { %1391 = vrot.lane.b32.xlu1 %v1346_v58, %s2231_s25  ;;  %v547_v18 = vadd.f32 %v2166_v62, %v546_v44  ;;  %v3600_v40 = vrot.slane %v2750_v15, 1  ;;  %v1283_v19 = vsel %vm1202_vm1, %v2596_v16, %v2620_v55  ;;  %v2846_v49 = vsel %vm1214_vm2, %v2813_v12, %v2780_v7 }
 0x13e   : > { %v819_v57 = vrot.slane %v818_v28, 4  ;;  %v825_v54 = vsel %vm677_vm0, %v623_v8, -inf  ;;  %v1284_v52 = vsel %vm1204_vm3, %v2663_v10, %v1283_v19  ;;  %v1110_v55 = vrot.slane %v1109_v26, 1 }
 0x13f   : > { %v796_v47 = vmax.f32 %v2750_v15, %v3600_v40  ;;  %v826_v45 = vrot.slane %v825_v54, 4  ;;  %v580_v11 = vmax.f32 %v547_v18, 0.0  ;;  %v1285_v15 = vsel %vm1206_vm4, %v2774_v24, %v1284_v52 }
 0x140   : > { %v820_v17 = vmax.f32 %v818_v28, %v819_v57  ;;  %v1286_v50 = vsel %vm1208_vm5, %v2789_v30, %v1285_v15  ;;  %v487_v3 = vadd.f32 %v2166_v62, %v486_v22  ;;  %v3601_v57 = vrot.slane %v2459_v53, 1 }
 0x141   : > { %v1222_v4 = vsel %vm1214_vm2, %v796_v47, %v789_v13  ;;  %v827_v44 = vmax.f32 %v825_v54, %v826_v45  ;;  %v644_v58 = vrot.slane %v580_v11, 4  ;;  %v1112_v8 = vsel %vm677_vm0, %v580_v11, -inf }
 0x142   : > { %v2856_v46 = vsel %vm1202_vm1, %v2780_v7, %v1222_v4  ;;  %v1287_v18 = vsel %vm1210_vm6, %v789_v13, %v1286_v50  ;;  %v821_v40 = vrot.slane %v820_v17, 2  ;;  %v1113_v19 = vrot.slane %v1112_v8, 4 }
 0x143   : > { %v1288_v52 = vsel %vm1212_vm7, %v796_v47, %v1287_v18  ;;  %v828_v24 = vrot.slane %v827_v44, 2  ;;  %v1119_v28 = vsel %vm677_vm0, %v644_v58, -inf  ;;  %v2867_v4 = vmax.f32 %v2459_v53, %v3601_v57 }
 0x144   : > { %v1297_v54 = vsel %vm1202_vm1, %v2493_v60, %v2498_v0  ;;  %v822_v45 = vmax.f32 %v820_v17, %v821_v40  ;;  %v1114_v11 = vmax.f32 %v1112_v8, %v1113_v19  ;;  %v1120_v13 = vrot.slane %v1119_v28, 4 }
 0x145   : > { %v560_v15 = vmax.f32 %v487_v3, 0.0  ;;  %v2872_v50 = vmax.f32 %v1109_v26, %v1110_v55  ;;  %v829_v18 = vmax.f32 %v827_v44, %v828_v24  ;;  %1416 = vrot.lane.b32.xlu1 %v1288_v52, %s3572_s29  ;;  %v2878_v62 = vsel %vm1214_vm2, %v2867_v4, %v2686_v56 }
 0x146   : > { %v1298_v53 = vsel %vm1204_vm3, %v2528_v59, %v1297_v54  ;;  %v823_v22 = vrot.slane %v822_v45, 1  ;;  %v1115_v58 = vrot.slane %v1114_v11, 2  ;;  %v1121_v0 = vmax.f32 %v1119_v28, %v1120_v13 }
 0x147   : > { %v624_v17 = vrot.slane %v560_v15, 4  ;;  %v830_v8 = vrot.slane %v829_v18, 1  ;;  %v1347_v3 = vsel %vm1214_vm2, %v2780_v7, %v796_v47  ;;  %v832_v24 = vsel %vm677_vm0, %v560_v15, -inf }
 0x148   : > { %v1299_v26 = vsel %vm1206_vm4, %v2532_v9, %v1298_v53  ;;  %v2887_v55 = vmax.f32 %v822_v45, %v823_v22  ;;  %v1116_v44 = vmax.f32 %v1114_v11, %v1115_v58  ;;  %v1122_v40 = vrot.slane %v1121_v0, 2 }
 0x149   : > { %v833_v19 = vrot.slane %v832_v24, 4  ;;  %v839_v52 = vsel %vm677_vm0, %v624_v17, -inf  ;;  %v1300_v28 = vsel %vm1208_vm5, %v2554_v2, %v1299_v26  ;;  %v1068_v57 = vrot.slane %v2672_v1, 1 }
 0x14a   : > { %v1376_v7 = vsel %vm1202_vm1, %v2578_v41, %v1375_v37  ;;  %v1117_v47 = vrot.slane %v1116_v44, 1  ;;  %v1123_v54 = vmax.f32 %v1121_v0, %v1122_v40  ;;  %v840_v15 = vrot.slane %v839_v52, 4 }
 0x14b   : > { %v834_v13 = vmax.f32 %v832_v24, %v833_v19  ;;  %v1301_v45 = vsel %vm1210_vm6, %v2686_v56, %v1300_v28  ;;  %v1069_v11 = vmax.f32 %v2672_v1, %v1068_v57  ;;  %v1377_v53 = vsel %vm1204_vm3, %v2584_v27, %v1376_v7 }
 0x14c   : > { %v1012_v22 = vrot.slane %v2746_v14, 1  ;;  %v2901_v58 = vmax.f32 %v1116_v44, %v1117_v47  ;;  %v841_v26 = vmax.f32 %v839_v52, %v840_v15  ;;  %v1302_v37 = vsel %vm1212_vm7, %v2867_v4, %v1301_v45 }
 0x14d   : > { %v835_v17 = vrot.slane %v834_v13, 2  ;;  %1420 = vrot.lane.b32.xlu1 %v1302_v37, %s3572_s29  ;;  %v1378_v0 = vsel %vm1206_vm4, %v2652_v29, %v1377_v53  ;;  %v1369_v1 = vsel %vm1202_vm1, %v2656_v32, %v2767_v21  ;;  %v1124_v24 = vrot.slane %v1123_v54, 1 }
 0x14e   : > { %v2909_v56 = vmax.f32 %v2746_v14, %v1012_v22  ;;  %v842_v40 = vrot.slane %v841_v26, 2  ;;  %v1379_v19 = vsel %vm1208_vm5, %v2654_v35, %v1378_v0  ;;  %v1370_v52 = vsel %vm1204_vm3, %v2698_v20, %v1369_v1 }
 0x14f   : > { %v836_v44 = vmax.f32 %v834_v13, %v835_v17  ;;  %v1380_v28 = vsel %vm1210_vm6, %v2706_v38, %v1379_v19  ;;  %v1371_v57 = vsel %vm1206_vm4, %v2708_v51, %v1370_v52  ;;  %v2925_v21 = vmax.f32 %v1123_v54, %v1124_v24 }
 0x150   : > { %v1250_v14 = vsel %vm1214_vm2, %v2799_v6, %v2909_v56  ;;  %v1381_v47 = vsel %vm1212_vm7, %v1069_v11, %v1380_v28  ;;  %v1372_v15 = vsel %vm1208_vm5, %v2715_v25, %v1371_v57  ;;  %v1325_v54 = vsel %vm1202_vm1, %v2811_v63, %v2820_v48 }
 0x151   : > { %v837_v7 = vrot.slane %v836_v44, 1  ;;  %v2930_v13 = vsel %vm1202_vm1, %v2806_v61, %v1250_v14  ;;  %1401 = vrot.lane.b32.xlu0 %v1381_v47, %s2231_s25  ;;  %v1373_v45 = vsel %vm1210_vm6, %v2758_v33, %v1372_v15  ;;  %v2940_v53 = vmax.f32 %v829_v18, %v830_v8 }
 0x152   : > { %v1374_v22 = vsel %vm1212_vm7, %v2909_v56, %v1373_v45  ;;  %v1326_v61 = vsel %vm1204_vm3, %v2832_v23, %v1325_v54  ;;  %v843_v37 = vmax.f32 %v841_v26, %v842_v40  ;;  %v1348_v1 = vsel %vm1202_vm1, %v2813_v12, %v1347_v3 }
 0x153   : > { %v2946_v17 = vmax.f32 %v836_v44, %v837_v7  ;;  %v1327_v0 = vsel %vm1206_vm4, %v2872_v50, %v1326_v61  ;;  %v3602_v48 = vrot.slane %v2712_v36, 1  ;;  %v1318_v8 = vsel %vm1202_vm1, %v2584_v27, %v2825_v31 }
 0x154   : > { %v1328_v24 = vsel %vm1208_vm5, %v2901_v58, %v1327_v0  ;;  %v844_v44 = vrot.slane %v843_v37, 1  ;;  %v1349_v26 = vsel %vm1204_vm3, %v2830_v42, %v1348_v1  ;;  %v1319_v40 = vsel %vm1204_vm3, %v2652_v29, %v1318_v8  ;;  %v1135_v8 = vld [vmem:[%s3542_s3 + $0x48] sm:$0xff] }
 0x155   : > { %v2955_v18 = vmax.f32 %v2712_v36, %v3602_v48  ;;  %1399 = vrot.lane.b32.xlu1 %v1374_v22, %s2231_s25  ;;  %v1329_v36 = vsel %vm1210_vm6, %v2925_v21, %v1328_v24  ;;  %v1350_v3 = vsel %vm1206_vm4, %v2887_v55, %v1349_v26  ;;  %v1320_v19 = vsel %vm1206_vm4, %v2654_v35, %v1319_v40  ;;  %v3603_v48 = vld [vmem:[#allocation10_spill] sm:$0xff] }
 0x156   : > { %v1332_v52 = vsel %vm1331_vm8, %v1329_v36, 0.0  ;;  %v2976_v28 = vmax.f32 %v843_v37, %v844_v44  ;;  %v1351_v14 = vsel %vm1208_vm5, %v2940_v53, %v1350_v3  ;;  %v1361_v7 = vsel %vm1214_vm2, %v2480_v34, %v2867_v4  ;;  %v1137_v37 = vld [vmem:[%s3542_s3 + $0x58] sm:$0xff]  ;;  %v3605_v3 = vld [vmem:[#allocation13_spill] sm:$0xff] }
 0x157   : > { %v1257_v31 = vsel %vm1214_vm2, %v2955_v18, %v1069_v11  ;;  %v1352_v47 = vsel %vm1210_vm6, %v2946_v17, %v1351_v14  ;;  %v1321_v15 = vsel %vm1208_vm5, %v2706_v38, %v1320_v19  ;;  %v1290_v45 = vsel %vm1202_vm1, %v2830_v42, %v2846_v49  ;;  %v1136_v49 = vld [vmem:[%s3542_s3 + $0x50] sm:$0xff]  ;;  %1488 = vmatpush.msrb.mxu1 %v1137_v37  ;;  %v3604_v44 = vld [vmem:[#allocation12_spill] sm:$0xff] }
 0x158   : > { %v2982_v57 = vsel %vm1202_vm1, %v2735_v43, %v1257_v31  ;;  %v1353_v54 = vsel %vm1212_vm7, %v2976_v28, %v1352_v47  ;;  %v1291_v22 = vsel %vm1204_vm3, %v2887_v55, %v1290_v45  ;;  %v1322_v4 = vsel %vm1210_vm6, %v1069_v11, %v1321_v15  ;;  %v1134_v19 = vld [vmem:[%s3542_s3 + $0x40] sm:$0xff]  ;;  %v1132_v37 = vld [vmem:[%s3542_s3 + $0x30] sm:$0xff] }
 0x159   : > { %1428 = vrot.lane.b32.xlu0 %v1332_v52, %s3572_s29  ;;  %1393 = vrot.lane.b32.xlu2 %v1353_v54, %s2231_s25  ;;  %v1292_v61 = vsel %vm1206_vm4, %v2940_v53, %v1291_v22  ;;  %v1362_v1 = vsel %vm1202_vm1, %v2505_v5, %v1361_v7  ;;  %v1323_v24 = vsel %vm1212_vm7, %v2955_v18, %v1322_v4  ;;  %v3606_v52 = vld [vmem:[#allocation14_spill] sm:$0xff]  ;;  %v3607_v7 = vld [vmem:[#allocation19_spill] sm:$0xff]  ;;  %v3609_v45 = vld [vmem:[#allocation5_spill] sm:$0xff] }
 0x15a   : > { %v1293_v0 = vsel %vm1208_vm5, %v2946_v17, %v1292_v61  ;;  %v1363_v11 = vsel %vm1204_vm3, %v3603_v48, %v1362_v1  ;;  %1489 = vmatpush.msrb.mxu1 %v1136_v49  ;;  %v1237_v40 = vsel %vm1202_vm1, %v2480_v34, %v2878_v62  ;;  %v1133_v34 = vld [vmem:[%s3542_s3 + $0x38] sm:$0xff]  ;;  %v3610_v22 = vld [vmem:[#allocation18_spill] sm:$0xff] }
 0x15b   : > { %v1364_v26 = vsel %vm1206_vm4, %v3604_v44, %v1363_v11  ;;  %v1294_v36 = vsel %vm1210_vm6, %v2976_v28, %v1293_v0  ;;  %v3608_v62 = vld [vmem:[#allocation16_spill] sm:$0xff]  ;;  %v1217_v4 = vsel %vm1204_vm3, %v2594_v39, %v3610_v22  ;;  %v1238_v61 = vsel %vm1204_vm3, %v2505_v5, %v1237_v40  ;;  %v1131_v5 = vld [vmem:[%s3542_s3 + $0x28] sm:$0xff] }
 0x15c   : > { %v1365_v31 = vsel %vm1208_vm5, %v3605_v3, %v1364_v26  ;;  %1490 = vmatpush.msrb.mxu1 %v1135_v8  ;;  %v1310_v15 = vsel %vm1214_vm2, %v2656_v32, %v3608_v62  ;;  %v1295_v54 = vsel %vm1212_vm7, %v3609_v45, %v1294_v36  ;;  %v1218_v49 = vsel %vm1206_vm4, %v2596_v16, %v1217_v4  ;;  %v1130_v8 = vld [vmem:[%s3542_s3 + $0x20] sm:$0xff] }
 0x15d   : > { %1426 = vrot.lane.b32.xlu1 %v1323_v24, %s3572_s29  ;;  %v1366_v14 = vsel %vm1210_vm6, %v3606_v52, %v1365_v31  ;;  %v1239_v0 = vsel %vm1206_vm4, %v3603_v48, %v1238_v61  ;;  %v1311_v39 = vsel %vm1202_vm1, %v2698_v20, %v1310_v15  ;;  %v1219_v16 = vsel %vm1208_vm5, %v2663_v10, %v1218_v49  ;;  %v3611_v26 = vld [vmem:[#allocation21_spill] sm:$0xff]  ;;  %v1129_v10 = vld [vmem:[%s3542_s3 + $0x18] sm:$0xff] }
 0x15e   : > { %v1367_v47 = vsel %vm1212_vm7, %v3607_v7, %v1366_v14  ;;  %1491 = vmatpush.msrb.mxu1 %v1134_v19  ;;  %v1240_v1 = vsel %vm1208_vm5, %v3604_v44, %v1239_v0  ;;  %v1382_v24 = vsel %vm1214_vm2, %v2735_v43, %v2955_v18  ;;  %v1312_v44 = vsel %vm1204_vm3, %v2708_v51, %v1311_v39  ;;  %v1128_v18 = vld [vmem:[%s3542_s3 + $0x10] sm:$0xff]  ;;  %v1127_v31 = vld [vmem:[%s3542_s3 + $0x8] sm:$0xff]  ;;  %v3613_v19 = vld [vmem:[#allocation20_spill] sm:$0xff] }
 0x15f   : > { %v1241_v11 = vsel %vm1210_vm6, %v3605_v3, %v1240_v1  ;;  %v1220_v40 = vsel %vm1210_vm6, %v3611_v26, %v1219_v16  ;;  %v1313_v36 = vsel %vm1206_vm4, %v2715_v25, %v1312_v44  ;;  %v3612_v3 = vld [vmem:[#allocation22_spill] sm:$0xff]  ;;  %v1126_v62 = vld [vmem:[%s3542_s3] sm:$0xff]  ;;  %v3616_v49 = vld [vmem:[#allocation11_spill] sm:$0xff]  ;;  %v1252_v1 = vsel %vm1204_vm3, %v2578_v41, %v2930_v13 }
 0x160   : > { %1492 = vmatpush.msrb.mxu1 %v1133_v34  ;;  %v3071_v48 = vsel %vm1212_vm7, %v3606_v52, %v1241_v11  ;;  %v1383_v43 = vsel %vm1202_vm1, %v3612_v3, %v1382_v24  ;;  %v1245_v52 = vsel %vm1204_vm3, %v2656_v32, %v3613_v19  ;;  %v1314_v14 = vsel %vm1208_vm5, %v2758_v33, %v1313_v36  ;;  %v3615_v61 = vld [vmem:[#allocation9_spill] sm:$0xff]  ;;  %v3617_v39 = vld [vmem:[#allocation15_spill] sm:$0xff]  ;;  %v3619_v36 = vld [vmem:[#allocation6_spill] sm:$0xff] }
 0x161   : > { %1418 = vrot.lane.b32.xlu2 %v1295_v54, %s3572_s29  ;;  %v1384_v7 = vsel %vm1204_vm3, %v2811_v63, %v1383_v43  ;;  %v1246_v34 = vsel %vm1206_vm4, %v2698_v20, %v1245_v52  ;;  %v1315_v54 = vsel %vm1210_vm6, %v2909_v56, %v1314_v14  ;;  %v1253_v11 = vsel %vm1206_vm4, %v2584_v27, %v1252_v1  ;;  %v3618_v16 = vld [vmem:[#allocation17_spill] sm:$0xff] }
 0x162   : > { %1493 = vmatpush.msrb.mxu1 %v1132_v37  ;;  %v1247_v32 = vsel %vm1208_vm5, %v2708_v51, %v1246_v34  ;;  %v1316_v20 = vsel %vm1212_vm7, %v2799_v6, %v1315_v54  ;;  %v3614_v6 = vld [vmem:[#allocation7_spill] sm:$0xff] }
 0x163   : > { %v1248_v15 = vsel %vm1210_vm6, %v2715_v25, %v1247_v32  ;;  %v1207_v37 = vsel %vm1206_vm4, %v3615_v61, %v3614_v6 }
 0x164   : > { %1494 = vmatpush.msrb.mxu1 %v1131_v5  ;;  %v3126_v51 = vsel %vm1212_vm7, %v2758_v33, %v1248_v15  ;;  %v1209_v0 = vsel %vm1208_vm5, %v3616_v49, %v1207_v37  ;;  %v1224_v33 = vsel %vm1204_vm3, %v2813_v12, %v2856_v46  ;;  %v1254_v12 = vsel %vm1208_vm5, %v2652_v29, %v1253_v11 }
 0x165   : > { %v1225_v5 = vsel %vm1206_vm4, %v2830_v42, %v1224_v33  ;;  %v1255_v41 = vsel %vm1210_vm6, %v2654_v35, %v1254_v12  ;;  %v1259_v42 = vsel %vm1204_vm3, %v3612_v3, %v2982_v57 }
 0x166   : > { %1495 = vmatpush.msrb.mxu1 %v1130_v8  ;;  %v1256_v46 = vsel %vm1212_vm7, %v2706_v38, %v1255_v41  ;;  %v1260_v13 = vsel %vm1206_vm4, %v2811_v63, %v1259_v42  ;;  %v1226_v38 = vsel %vm1208_vm5, %v2887_v55, %v1225_v5  ;;  %v1229_v55 = vsel %vm1214_vm2, %v3609_v45, %v2976_v28 }
 0x167   : > { %v1261_v35 = vsel %vm1208_vm5, %v2832_v23, %v1260_v13  ;;  %v1227_v63 = vsel %vm1210_vm6, %v2940_v53, %v1226_v38  ;;  %v3620_v53 = vld [vmem:[#allocation8_spill] sm:$0xff] }
 0x168   : > { %1496 = vmatpush.msrb.mxu1 %v1129_v10  ;;  %v1262_v57 = vsel %vm1210_vm6, %v2872_v50, %v1261_v35 }
 0x169   : > { %1397 = vrot.lane.b32.xlu2 %v1367_v47, %s2231_s25  ;;  %v1221_v47 = vsel %vm1212_vm7, %v2789_v30, %v1220_v40  ;;  %v1385_v30 = vsel %vm1206_vm4, %v2832_v23, %v1384_v7  ;;  %v1263_v26 = vsel %vm1212_vm7, %v2901_v58, %v1262_v57  ;;  %v1228_v40 = vsel %vm1212_vm7, %v2946_v17, %v1227_v63 }
 0x16a   : > { %1497 = vmatpush.msrb.mxu1 %v1128_v18  ;;  %v1386_v22 = vsel %vm1208_vm5, %v2872_v50, %v1385_v30  ;;  %v1230_v50 = vsel %vm1202_vm1, %v3619_v36, %v1229_v55 }
 0x16b   : > { %v1387_v25 = vsel %vm1210_vm6, %v2901_v58, %v1386_v22  ;;  %v1231_v18 = vsel %vm1204_vm3, %v3620_v53, %v1230_v50 }
 0x16c   : > { %1498 = vmatpush.msrb.mxu1 %v1127_v31  ;;  %v1388_v56 = vsel %vm1212_vm7, %v2925_v21, %v1387_v25  ;;  %v1211_v21 = vsel %vm1210_vm6, %v3617_v39, %v1209_v0  ;;  %v1232_v31 = vsel %vm1206_vm4, %v2493_v60, %v1231_v18 }
 0x16d   : > { %v1213_v8 = vsel %vm1212_vm7, %v3618_v16, %v1211_v21  ;;  %v1233_v45 = vsel %vm1208_vm5, %v2528_v59, %v1232_v31 }
 0x16e   : > { %1499 = vmatpush.msrb.mxu1 %v1126_v62  ;;  %v1273_v27 = vsel %vm1272_vm9, 0.0, %v1213_v8  ;;  %v1234_v52 = vsel %vm1210_vm6, %v2532_v9, %v1233_v45 }
 0x171   : > { %1424 = vrot.lane.b32.xlu2 %v1316_v20, %s3572_s29 }
 0x175   : > { %v1390_v4 = vpop.permute.xlu0 %1389 }
 0x176   : > { %v1439_v29 = vsel %vm1438_vm10, %v1273_v27, %v1390_v4 }
 0x179   : > { %1403 = vrot.lane.b32.xlu2 %v1388_v56, %s2231_s25 }
 0x183   : > { %v1415_v24 = vpop.permute.xlu0 %1414 }
 0x184   : > { %v1448_v44 = vsel %vm1447_vm11, %v1439_v29, %v1415_v24 }
 0x185   : > { %2055 = vmatmul.msk.f32.vlgmr.msrb.gmra.mxu1 %vm1459_vm12, %v1448_v44 }
 0x18b   : > { %v1396_v14 = vpop.permute.xlu0 %1395 }
 0x19c   : > { %v1423_v32 = vpop.permute.xlu0 %1422 }
 0x1af   : > { %v1392_v23 = vpop.permute.xlu1 %1391 }
 0x1b0   : > { %v1440_v3 = vsel %vm1438_vm10, %v1221_v47, %v1392_v23  ;;  %v1235_v47 = vsel %vm1212_vm7, %v2554_v2, %v1234_v52 }
 0x1b1   : > { %v1442_v34 = vsel %vm1438_vm10, %v1235_v47, %v1396_v14 }
 0x1b3   : > { %v1394_v10 = vpop.permute.xlu2 %1393 }
 0x1b4   : > { %v1441_v19 = vsel %vm1438_vm10, %v1228_v40, %v1394_v10 }
 0x1b7   : > { %v1417_v43 = vpop.permute.xlu1 %1416 }
 0x1b8   : > { %v1449_v58 = vsel %vm1447_vm11, %v1440_v3, %v1417_v43 }
 0x1b9   : > { %2056 = vmatmul.msk.f32.gmra.mxu1 %vm1459_vm12, %v1449_v58 }
 0x1bb   : > { %v1419_v17 = vpop.permute.xlu2 %1418 }
 0x1bc   : > { %v1450_v28 = vsel %vm1447_vm11, %v1441_v19, %v1419_v17 }
 0x1bf   : > { %v1421_v7 = vpop.permute.xlu1 %1420 }
 0x1c0   : > { %v1451_v60 = vsel %vm1447_vm11, %v1442_v34, %v1421_v7 }
 0x1c1   : > { %2057 = vmatmul.msk.f32.gmra.mxu1 %vm1459_vm12, %v1450_v28 }
 0x1c3   : > { %v1398_v62 = vpop.permute.xlu2 %1397  ;;  %v1402_v20 = vpop.permute.xlu0 %1401 }
 0x1c4   : > { %v1443_v59 = vsel %vm1438_vm10, %v3071_v48, %v1398_v62  ;;  %v1445_v25 = vsel %vm1438_vm10, %v1256_v46, %v1402_v20 }
 0x1c5   : > { %v1452_v15 = vsel %vm1447_vm11, %v1443_v59, %v1423_v32 }
 0x1c7   : > { %v1400_v9 = vpop.permute.xlu1 %1399 }
 0x1c8   : > { %v1444_v2 = vsel %vm1438_vm10, %v3126_v51, %v1400_v9  ;;  %v3220_v51 = vld [vmem:[%s3543_s4] ss:$0 sm:$0xff] }
 0x1c9   : > { %2058 = vmatmul.msk.f32.gmra.mxu1 %vm1459_vm12, %v1451_v60 }
 0x1cb   : > { %v1425_v54 = vpop.permute.xlu2 %1424  ;;  %v1429_v6 = vpop.permute.xlu0 %1428 }
 0x1cc   : > { %v1453_v30 = vsel %vm1447_vm11, %v1444_v2, %v1425_v54 }
 0x1cf   : > { %v1427_v22 = vpop.permute.xlu1 %1426 }
 0x1d0   : > { %v1454_v48 = vsel %vm1447_vm11, %v1445_v25, %v1427_v22 }
 0x1d1   : > { %2059 = vmatmul.msk.f32.gmra.mxu1 %vm1459_vm12, %v1452_v15 }
 0x1d3   : > { %v1404_v56 = vpop.permute.xlu2 %1403 }
 0x1d4   : > { %v1446_v4 = vsel %vm1438_vm10, %v1263_v26, %v1404_v56 }
 0x1d5   : > { %v1455_v61 = vsel %vm1447_vm11, %v1446_v4, %v1429_v6 }
 0x1d9   : > { %2060 = vmatmul.msk.f32.gmra.mxu1 %vm1459_vm12, %v1453_v30 }
 0x1e1   : > { %2061 = vmatmul.msk.f32.gmra.mxu1 %vm1459_vm12, %v1454_v48 }
 0x1e9   : > { %2062 = vmatmul.msk.f32.gmra.mxu1 %vm1459_vm12, %v1455_v61 }
 0x202   : > { %v1501_v37 = vpop.f32.mrf.mxu1 }
 0x203   : > { %v1502_v49 = vadd.f32 %v3220_v51, %v1501_v37 }
 0x205   : > { %v1525_v0 = vmax.f32 %v1502_v49, 0.0 }
 0x207   : > { %v1541_v33 = vrot.slane %v1525_v0, 4  ;;  %v1557_v1 = vsel %vm677_vm0, %v1525_v0, -inf }
 0x208   : > { %v1558_v39 = vrot.slane %v1557_v1, 4 }
 0x209   : > { %v1564_v21 = vsel %vm677_vm0, %v1541_v33, -inf }
 0x20a   : > { %v1559_v5 = vmax.f32 %v1557_v1, %v1558_v39  ;;  %v1565_v11 = vrot.slane %v1564_v21, 4 }
 0x20c   : > { %v1560_v16 = vrot.slane %v1559_v5, 2  ;;  %v1566_v8 = vmax.f32 %v1564_v21, %v1565_v11 }
 0x20e   : > { %v1561_v12 = vmax.f32 %v1559_v5, %v1560_v16  ;;  %v1567_v41 = vrot.slane %v1566_v8, 2 }
 0x210   : > { %v1562_v46 = vrot.slane %v1561_v12, 1  ;;  %v1568_v42 = vmax.f32 %v1566_v8, %v1567_v41 }
 0x212   : > { %v1569_v27 = vrot.slane %v1568_v42, 1  ;;  %v1563_v13 = vmax.f32 %v1561_v12, %v1562_v46 }
 0x214   : > { %v1570_v29 = vmax.f32 %v1568_v42, %v1569_v27 }
 0x216   : > { %v1697_v24 = vsel %vm1202_vm1, %v1570_v29, %v1563_v13  ;;  %v1729_v61 = vsel %vm1214_vm2, %v1570_v29, %v1563_v13 }
 0x236   : > { %v1504_v35 = vpop.f32.mrf.mxu1 }
 0x237   : > { %v1505_v44 = vadd.f32 %v3220_v51, %v1504_v35 }
 0x239   : > { %v1526_v38 = vmax.f32 %v1505_v44, 0.0 }
 0x23b   : > { %v1542_v57 = vrot.slane %v1526_v38, 4  ;;  %v1571_v26 = vsel %vm677_vm0, %v1526_v38, -inf }
 0x23c   : > { %v1572_v63 = vrot.slane %v1571_v26, 4 }
 0x23d   : > { %v1578_v40 = vsel %vm677_vm0, %v1542_v57, -inf }
 0x23e   : > { %v1573_v23 = vmax.f32 %v1571_v26, %v1572_v63  ;;  %v1579_v10 = vrot.slane %v1578_v40, 4  ;;  %v1507_v55 = vpop.f32.mrf.mxu1 }
 0x23f   : > { %v1508_v36 = vadd.f32 %v3220_v51, %v1507_v55 }
 0x240   : > { %v1574_v50 = vrot.slane %v1573_v23, 2  ;;  %v1580_v3 = vmax.f32 %v1578_v40, %v1579_v10 }
 0x241   : > { %v1527_v43 = vmax.f32 %v1508_v36, 0.0 }
 0x242   : > { %v1575_v58 = vmax.f32 %v1573_v23, %v1574_v50  ;;  %v1581_v53 = vrot.slane %v1580_v3, 2 }
 0x243   : > { %v1543_v18 = vrot.slane %v1527_v43, 4  ;;  %v1585_v17 = vsel %vm677_vm0, %v1527_v43, -inf }
 0x244   : > { %v1576_v31 = vrot.slane %v1575_v58, 1  ;;  %v1586_v19 = vrot.slane %v1585_v17, 4  ;;  %v1582_v52 = vmax.f32 %v1580_v3, %v1581_v53 }
 0x245   : > { %v1592_v28 = vsel %vm677_vm0, %v1543_v18, -inf }
 0x246   : > { %v1577_v45 = vmax.f32 %v1575_v58, %v1576_v31  ;;  %v1587_v14 = vmax.f32 %v1585_v17, %v1586_v19  ;;  %v1593_v7 = vrot.slane %v1592_v28, 4  ;;  %v1510_v47 = vpop.f32.mrf.mxu1  ;;  %v1583_v15 = vrot.slane %v1582_v52, 1 }
 0x247   : > { %v1511_v34 = vadd.f32 %v3220_v51, %v1510_v47  ;;  %v1680_v47 = vld [vmem:[%s3544_s5 + $0x58] sm:$0xff] }
 0x248   : > { %v3234_v60 = vsel %vm1204_vm3, %v1577_v45, %v1697_v24  ;;  %v1588_v62 = vrot.slane %v1587_v14, 2  ;;  %v1594_v59 = vmax.f32 %v1592_v28, %v1593_v7  ;;  %v3239_v37 = vmax.f32 %v1582_v52, %v1583_v15  ;;  %1773 = vmatpush.msrb.mxu2 %v1680_v47 }
 0x249   : > { %v1528_v32 = vmax.f32 %v1511_v34, 0.0  ;;  %v1730_v33 = vsel %vm1202_vm1, %v1577_v45, %v1729_v61  ;;  %v1714_v11 = vsel %vm1214_vm2, %v1577_v45, %v1570_v29  ;;  %v1679_v34 = vld [vmem:[%s3544_s5 + $0x50] sm:$0xff] }
 0x24a   : > { %v1589_v9 = vmax.f32 %v1587_v14, %v1588_v62  ;;  %v1595_v54 = vrot.slane %v1594_v59, 2  ;;  %v1731_v42 = vsel %vm1204_vm3, %v3239_v37, %v1730_v33  ;;  %v1715_v29 = vsel %vm1202_vm1, %v3239_v37, %v1714_v11  ;;  %1774 = vmatpush.msrb.mxu2 %v1679_v34 }
 0x24b   : > { %v1544_v2 = vrot.slane %v1528_v32, 4  ;;  %v1599_v30 = vsel %vm677_vm0, %v1528_v32, -inf }
 0x24c   : > { %v1600_v20 = vrot.slane %v1599_v30, 4  ;;  %v1590_v22 = vrot.slane %v1589_v9, 1  ;;  %v1596_v25 = vmax.f32 %v1594_v59, %v1595_v54 }
 0x24d   : > { %v1606_v48 = vsel %vm677_vm0, %v1544_v2, -inf  ;;  %v1678_v2 = vld [vmem:[%s3544_s5 + $0x48] sm:$0xff] }
 0x24e   : > { %v1601_v56 = vmax.f32 %v1599_v30, %v1600_v20  ;;  %v1607_v4 = vrot.slane %v1606_v48, 4  ;;  %v1513_v6 = vpop.f32.mrf.mxu1  ;;  %v1597_v49 = vrot.slane %v1596_v25, 1  ;;  %v3243_v1 = vmax.f32 %v1589_v9, %v1590_v22  ;;  %1775 = vmatpush.msrb.mxu2 %v1678_v2 }
 0x24f   : > { %v1514_v0 = vadd.f32 %v3220_v51, %v1513_v6 }
 0x250   : > { %v1602_v39 = vrot.slane %v1601_v56, 2  ;;  %v1608_v21 = vmax.f32 %v1606_v48, %v1607_v4  ;;  %v3246_v12 = vmax.f32 %v1596_v25, %v1597_v49  ;;  %v1732_v35 = vsel %vm1206_vm4, %v3243_v1, %v1731_v42  ;;  %v1677_v4 = vld [vmem:[%s3544_s5 + $0x40] sm:$0xff] }
 0x251   : > { %v1529_v5 = vmax.f32 %v1514_v0, 0.0  ;;  %v1716_v55 = vsel %vm1204_vm3, %v3243_v1, %v1715_v29  ;;  %v1676_v0 = vld [vmem:[%s3544_s5 + $0x38] sm:$0xff]  ;;  %1776 = vmatpush.msrb.mxu2 %v1677_v4  ;;  %v1699_v4 = vsel %vm1206_vm4, %v3239_v37, %v3234_v60  ;;  %v1674_v60 = vld [vmem:[%s3544_s5 + $0x28] sm:$0xff] }
 0x252   : > { %v1603_v16 = vmax.f32 %v1601_v56, %v1602_v39  ;;  %v1609_v8 = vrot.slane %v1608_v21, 2  ;;  %v1733_v10 = vsel %vm1208_vm5, %v3246_v12, %v1732_v35  ;;  %v1717_v28 = vsel %vm1206_vm4, %v3246_v12, %v1716_v55 }
 0x253   : > { %v1545_v41 = vrot.slane %v1529_v5, 4  ;;  %v1613_v46 = vsel %vm677_vm0, %v1529_v5, -inf  ;;  %1777 = vmatpush.msrb.mxu2 %v1676_v0 }
 0x254   : > { %v1604_v27 = vrot.slane %v1603_v16, 1  ;;  %v1610_v13 = vmax.f32 %v1608_v21, %v1609_v8  ;;  %v1614_v24 = vrot.slane %v1613_v46, 4 }
 0x255   : > { %v1620_v44 = vsel %vm677_vm0, %v1545_v41, -inf }
 0x256   : > { %v3256_v38 = vmax.f32 %v1603_v16, %v1604_v27  ;;  %v1615_v57 = vmax.f32 %v1613_v46, %v1614_v24  ;;  %v1621_v26 = vrot.slane %v1620_v44, 4  ;;  %v1516_v63 = vpop.f32.mrf.mxu1  ;;  %v1611_v40 = vrot.slane %v1610_v13, 1 }
 0x257   : > { %v1517_v23 = vadd.f32 %v3220_v51, %v1516_v63 }
 0x258   : > { %v1616_v36 = vrot.slane %v1615_v57, 2  ;;  %v1622_v50 = vmax.f32 %v1620_v44, %v1621_v26  ;;  %v1612_v3 = vmax.f32 %v1610_v13, %v1611_v40  ;;  %v1734_v43 = vsel %vm1210_vm6, %v3256_v38, %v1733_v10 }
 0x259   : > { %v1530_v58 = vmax.f32 %v1517_v23, 0.0  ;;  %v1718_v7 = vsel %vm1208_vm5, %v3256_v38, %v1717_v28 }
 0x25a   : > { %v1617_v53 = vmax.f32 %v1615_v57, %v1616_v36  ;;  %v1623_v18 = vrot.slane %v1622_v50, 2  ;;  %v1735_v17 = vsel %vm1212_vm7, %v1612_v3, %v1734_v43  ;;  %v1719_v20 = vsel %vm1210_vm6, %v1612_v3, %v1718_v7 }
 0x25b   : > { %v1546_v31 = vrot.slane %v1530_v58, 4  ;;  %v1627_v19 = vsel %vm677_vm0, %v1530_v58, -inf  ;;  %1743 = vrot.lane.b32.xlu1 %v1735_v17, %s2231_s25 }
 0x25c   : > { %v1618_v45 = vrot.slane %v1617_v53, 1  ;;  %v1624_v52 = vmax.f32 %v1622_v50, %v1623_v18  ;;  %v1628_v14 = vrot.slane %v1627_v19, 4 }
 0x25d   : > { %v1634_v62 = vsel %vm677_vm0, %v1546_v31, -inf }
 0x25e   : > { %v1625_v59 = vrot.slane %v1624_v52, 1  ;;  %v1629_v32 = vmax.f32 %v1627_v19, %v1628_v14  ;;  %v1635_v15 = vrot.slane %v1634_v62, 4  ;;  %v1519_v9 = vpop.f32.mrf.mxu1  ;;  %v1619_v54 = vmax.f32 %v1617_v53, %v1618_v45 }
 0x25f   : > { %v1520_v30 = vadd.f32 %v3220_v51, %v1519_v9 }
 0x260   : > { %v1626_v22 = vmax.f32 %v1624_v52, %v1625_v59  ;;  %v1630_v25 = vrot.slane %v1629_v32, 2  ;;  %v1636_v48 = vmax.f32 %v1634_v62, %v1635_v15  ;;  %v1703_v56 = vsel %vm1214_vm2, %v1619_v54, %v1612_v3 }
 0x261   : > { %v1531_v6 = vmax.f32 %v1520_v30, 0.0  ;;  %v1720_v61 = vsel %vm1212_vm7, %v1619_v54, %v1719_v20 }
 0x262   : > { %v3290_v49 = vsel %vm1202_vm1, %v1626_v22, %v1703_v56  ;;  %1750 = vrot.lane.b32.xlu2 %v1720_v61, %s3572_s29  ;;  %v1631_v33 = vmax.f32 %v1629_v32, %v1630_v25  ;;  %v1637_v39 = vrot.slane %v1636_v48, 2  ;;  %v1736_v18 = vsel %vm1214_vm2, %v1626_v22, %v1619_v54 }
 0x263   : > { %v1547_v21 = vrot.slane %v1531_v6, 4  ;;  %v1641_v5 = vsel %vm677_vm0, %v1531_v6, -inf  ;;  %v1700_v6 = vsel %vm1208_vm5, %v3243_v1, %v1699_v4  ;;  %v1673_v1 = vld [vmem:[%s3544_s5 + $0x20] sm:$0xff] }
 0x264   : > { %v1642_v11 = vrot.slane %v1641_v5, 4  ;;  %v1632_v42 = vrot.slane %v1631_v33, 1  ;;  %v1638_v27 = vmax.f32 %v1636_v48, %v1637_v39  ;;  %v1701_v61 = vsel %vm1210_vm6, %v3246_v12, %v1700_v6  ;;  %v1675_v39 = vld [vmem:[%s3544_s5 + $0x30] sm:$0xff]  ;;  %v1672_v12 = vld [vmem:[%s3544_s5 + $0x18] sm:$0xff] }
 0x265   : > { %v1648_v16 = vsel %vm677_vm0, %v1547_v21, -inf  ;;  %v1702_v0 = vsel %vm1212_vm7, %v3256_v38, %v1701_v61  ;;  %1778 = vmatpush.msrb.mxu2 %v1675_v39  ;;  %v1671_v38 = vld [vmem:[%s3544_s5 + $0x10] sm:$0xff]  ;;  %v1670_v21 = vld [vmem:[%s3544_s5 + $0x8] sm:$0xff] }
 0x266   : > { %v1643_v8 = vmax.f32 %v1641_v5, %v1642_v11  ;;  %v1649_v41 = vrot.slane %v1648_v16, 4  ;;  %v1522_v46 = vpop.f32.mrf.mxu1  ;;  %v1633_v26 = vmax.f32 %v1631_v33, %v1632_v42  ;;  %v1639_v63 = vrot.slane %v1638_v27, 1 }
 0x267   : > { %v1523_v13 = vadd.f32 %v3220_v51, %v1522_v46  ;;  %1779 = vmatpush.msrb.mxu2 %v1674_v60 }
 0x268   : > { %v1644_v24 = vrot.slane %v1643_v8, 2  ;;  %v1650_v35 = vmax.f32 %v1648_v16, %v1649_v41  ;;  %v1640_v58 = vmax.f32 %v1638_v27, %v1639_v63  ;;  %v1721_v51 = vsel %vm1214_vm2, %v1633_v26, %v1626_v22  ;;  %v1669_v16 = vld [vmem:[%s3544_s5] sm:$0xff] }
 0x269   : > { %v1532_v44 = vmax.f32 %v1523_v13, 0.0  ;;  %v1737_v28 = vsel %vm1202_vm1, %v1633_v26, %v1736_v18  ;;  %v1705_v33 = vsel %vm1204_vm3, %v1633_v26, %v3290_v49  ;;  %1780 = vmatpush.msrb.mxu2 %v1673_v1  ;;  %v1712_v41 = vsel %vm1272_vm9, 0.0, %v1702_v0  ;;  %v1842_v18 = vld [vmem:[%s3546_s7 + $0x68] sm:$0xff] }
 0x26a   : > { %v1645_v29 = vmax.f32 %v1643_v8, %v1644_v24  ;;  %v1651_v57 = vrot.slane %v1650_v35, 2  ;;  %v1738_v7 = vsel %vm1204_vm3, %v1640_v58, %v1737_v28  ;;  %v1722_v47 = vsel %vm1202_vm1, %v1640_v58, %v1721_v51  ;;  %v1834_v0 = vld [vmem:[%s3546_s7 + $0x28] sm:$0xff] }
 0x26b   : > { %v1548_v40 = vrot.slane %v1532_v44, 4  ;;  %v1655_v23 = vsel %vm677_vm0, %v1532_v44, -inf  ;;  %v1706_v37 = vsel %vm1206_vm4, %v1640_v58, %v1705_v33  ;;  %1781 = vmatpush.msrb.mxu2 %v1672_v12  ;;  %v1843_v58 = vld [vmem:[%s3546_s7 + $0x70] sm:$0xff] }
 0x26c   : > { %v1646_v10 = vrot.slane %v1645_v29, 1  ;;  %v1652_v55 = vmax.f32 %v1650_v35, %v1651_v57  ;;  %v1656_v36 = vrot.slane %v1655_v23, 4 }
 0x26d   : > { %v1662_v50 = vsel %vm677_vm0, %v1548_v40, -inf  ;;  %1782 = vmatpush.msrb.mxu2 %v1671_v38  ;;  %v1852_v40 = vld [vmem:[%s3546_s7 + $0xb8] sm:$0xff]  ;;  %vm1967_vm0 = vcmask 278528  }
 0x26e   : > { %v1657_v3 = vmax.f32 %v1655_v23, %v1656_v36  ;;  %v1663_v43 = vrot.slane %v1662_v50, 4  ;;  %v1653_v53 = vrot.slane %v1652_v55, 1  ;;  %v1647_v17 = vmax.f32 %v1645_v29, %v1646_v10  ;;  %v2160_v29 = vld [vmem:[%s3545_s6] ss:$0 sm:$0xff]  ;;  %v1851_v23 = vld [vmem:[%s3546_s7 + $0xb0] sm:$0xff] }
 0x26f   : > { %1783 = vmatpush.msrb.mxu2 %v1670_v21  ;;  %v1849_v36 = vld [vmem:[%s3546_s7 + $0xa0] sm:$0xff] }
 0x270   : > { %v1658_v31 = vrot.slane %v1657_v3, 2  ;;  %v1664_v19 = vmax.f32 %v1662_v50, %v1663_v43  ;;  %v1654_v14 = vmax.f32 %v1652_v55, %v1653_v53  ;;  %v1739_v59 = vsel %vm1206_vm4, %v1647_v17, %v1738_v7  ;;  %v1850_v55 = vld [vmem:[%s3546_s7 + $0xa8] sm:$0xff]  ;;  %v1844_v43 = vld [vmem:[%s3546_s7 + $0x78] sm:$0xff]  ;;  %v1847_v53 = vld [vmem:[%s3546_s7 + $0x90] sm:$0xff] }
 0x271   : > { %v1723_v32 = vsel %vm1204_vm3, %v1647_v17, %v1722_v47  ;;  %v1707_v49 = vsel %vm1208_vm5, %v1647_v17, %v1706_v37  ;;  %1784 = vmatpush.msrb.mxu2 %v1669_v16  ;;  %1880 = vmatpush.msrb.mxu3 %v1844_v43  ;;  %v1839_v7 = vld [vmem:[%s3546_s7 + $0x50] sm:$0xff]  ;;  %v1833_v37 = vld [vmem:[%s3546_s7 + $0x20] sm:$0xff] }
 0x272   : > { %v1659_v45 = vmax.f32 %v1657_v3, %v1658_v31  ;;  %v1665_v52 = vrot.slane %v1664_v19, 2  ;;  %v1740_v54 = vsel %vm1208_vm5, %v1654_v14, %v1739_v59  ;;  %v1724_v2 = vsel %vm1206_vm4, %v1654_v14, %v1723_v32  ;;  %v1848_v3 = vld [vmem:[%s3546_s7 + $0x98] sm:$0xff]  ;;  %v1846_v31 = vld [vmem:[%s3546_s7 + $0x88] sm:$0xff]  ;;  %v1831_v16 = vld [vmem:[%s3546_s7 + $0x10] sm:$0xff] }
 0x273   : > { %v1708_v5 = vsel %vm1210_vm6, %v1654_v14, %v1707_v49  ;;  %1908 = vmatpush.msra.mxu2 %v1852_v40  ;;  %1881 = vmatpush.msrb.mxu3 %v1843_v58  ;;  %v1832_v49 = vld [vmem:[%s3546_s7 + $0x18] sm:$0xff]  ;;  %v1942_v43 = vld [vmem:[%s3548_s9 + $0x60] sm:$0xff] }
 0x274   : > { %v1660_v34 = vrot.slane %v1659_v45, 1  ;;  %v1666_v62 = vmax.f32 %v1664_v19, %v1665_v52  ;;  %v1841_v19 = vld [vmem:[%s3546_s7 + $0x60] sm:$0xff]  ;;  %v1840_v52 = vld [vmem:[%s3546_s7 + $0x58] sm:$0xff] }
 0x275   : > { %1909 = vmatpush.msra.mxu2 %v1851_v23  ;;  %1882 = vmatpush.msrb.mxu3 %v1842_v18  ;;  %v1941_v58 = vld [vmem:[%s3548_s9 + $0x58] sm:$0xff]  ;;  %v1938_v18 = vld [vmem:[%s3548_s9 + $0x40] sm:$0xff] }
 0x276   : > { %v1661_v15 = vmax.f32 %v1659_v45, %v1660_v34  ;;  %v1667_v9 = vrot.slane %v1666_v62, 1  ;;  %v1845_v45 = vld [vmem:[%s3546_s7 + $0x80] sm:$0xff] }
 0x277   : > { %1910 = vmatpush.msra.mxu2 %v1850_v55  ;;  %1883 = vmatpush.msrb.mxu3 %v1841_v19  ;;  %v1935_v19 = vld [vmem:[%s3548_s9 + $0x28] sm:$0xff] }
 0x278   : > { %v1668_v30 = vmax.f32 %v1666_v62, %v1667_v9  ;;  %v1741_v20 = vsel %vm1210_vm6, %v1661_v15, %v1740_v54  ;;  %v1725_v22 = vsel %vm1208_vm5, %v1661_v15, %v1724_v2  ;;  %v1709_v11 = vsel %vm1212_vm7, %v1661_v15, %v1708_v5  ;;  %v1838_v62 = vld [vmem:[%s3546_s7 + $0x48] sm:$0xff]  ;;  %v1837_v15 = vld [vmem:[%s3546_s7 + $0x40] sm:$0xff]  ;;  %v1836_v2 = vld [vmem:[%s3546_s7 + $0x38] sm:$0xff] }
 0x279   : > { %1911 = vmatpush.msra.mxu2 %v1849_v36  ;;  %1884 = vmatpush.msrb.mxu3 %v1840_v52  ;;  %v1945_v36 = vld [vmem:[%s3548_s9 + $0x78] sm:$0xff]  ;;  %v1932_v52 = vld [vmem:[%s3548_s9 + $0x10] sm:$0xff] }
 0x27a   : > { %v1742_v25 = vsel %vm1212_vm7, %v1668_v30, %v1741_v20  ;;  %v1726_v48 = vsel %vm1210_vm6, %v1668_v30, %v1725_v22 }
 0x27b   : > { %1745 = vrot.lane.b32.xlu0 %v1742_v25, %s2231_s25  ;;  %v1728_v56 = vsel %vm1331_vm8, %v1726_v48, 0.0  ;;  %1912 = vmatpush.msra.mxu2 %v1848_v3  ;;  %v1835_v48 = vld [vmem:[%s3546_s7 + $0x30] sm:$0xff]  ;;  %v1943_v3 = vld [vmem:[%s3548_s9 + $0x68] sm:$0xff] }
 0x27c   : > { %1752 = vrot.lane.b32.xlu1 %v1728_v56, %s3572_s29  ;;  %1885 = vmatpush.msrb.mxu3 %v1839_v7  ;;  %v2161_v7 = vld [vmem:[%s3547_s8] ss:$0 sm:$0xff] }
 0x27d   : > { %1913 = vmatpush.msra.mxu2 %v1847_v53  ;;  %v1939_v53 = vld [vmem:[%s3548_s9 + $0x48] sm:$0xff] }
 0x27e   : > { %1886 = vmatpush.msrb.mxu3 %v1838_v62 }
 0x27f   : > { %1914 = vmatpush.msra.mxu2 %v1846_v31  ;;  %v1936_v31 = vld [vmem:[%s3548_s9 + $0x30] sm:$0xff] }
 0x280   : > { %1887 = vmatpush.msrb.mxu3 %v1837_v15 }
 0x281   : > { %1915 = vmatpush.msra.mxu2 %v1845_v45  ;;  %v1933_v45 = vld [vmem:[%s3548_s9 + $0x18] sm:$0xff] }
 0x282   : > { %1888 = vmatpush.msrb.mxu3 %v1836_v2 }
 0x284   : > { %1889 = vmatpush.msrb.mxu3 %v1835_v48  ;;  %v1946_v48 = vld [vmem:[%s3549_s10] sm:$0x1] }
 0x286   : > { %1890 = vmatpush.msrb.mxu3 %v1834_v0 }
 0x288   : > { %1891 = vmatpush.msrb.mxu3 %v1833_v37 }
 0x28a   : > { %1892 = vmatpush.msrb.mxu3 %v1832_v49 }
 0x28c   : > { %1893 = vmatpush.msrb.mxu3 %v1831_v16 }
 0x2bc   : > { %v1751_v46 = vpop.permute.xlu2 %1750 }
 0x2cd   : > { %v1744_v8 = vpop.permute.xlu1 %1743 }
 0x2ce   : > { %v1756_v42 = vsel %vm1438_vm10, %v1712_v41, %v1744_v8 }
 0x2cf   : > { %v1758_v27 = vsel %vm1447_vm11, %v1756_v42, %v1751_v46  ;;  %v1830_v42 = vld [vmem:[%s3546_s7 + $0x8] sm:$0xff] }
 0x2d0   : > { %2063 = vmatmul.msk.f32.vlgmr.msrb.gmra.mxu2 %vm1459_vm12, %v1758_v27  ;;  %1894 = vmatpush.msrb.mxu3 %v1830_v42 }
 0x2ed   : > { %v1746_v13 = vpop.permute.xlu0 %1745 }
 0x2ee   : > { %v1757_v24 = vsel %vm1438_vm10, %v1709_v11, %v1746_v13  ;;  %v1753_v35 = vpop.permute.xlu1 %1752 }
 0x2ef   : > { %v1759_v44 = vsel %vm1447_vm11, %v1757_v24, %v1753_v35 }
 0x2f0   : > { %2064 = vmatmul.msk.f32.gmra.mxu2 %vm1459_vm12, %v1759_v44  ;;  %v1829_v44 = vld [vmem:[%s3546_s7] sm:$0xff] }
 0x2f1   : > { %1895 = vmatpush.msrb.mxu3 %v1829_v44 }
 0x2f3   : > { %1947 = vmatpush.msra.mxu3 %v1945_v36 }
 0x353   : > { %v1786_v57 = vpop.f32.mrf.mxu2 }
 0x354   : > { %v1787_v26 = vadd.f32 %v2160_v29, %v1786_v57 }
 0x356   : > { %v1792_v63 = vmax.f32 %v1787_v26, 0.0 }
 0x358   : > { %v1796_v10 = vrot.slane %v1792_v63, 4  ;;  %v1801_v51 = vsel %vm1800_vm13, %v1792_v63, -inf }
 0x359   : > { %v1802_v28 = vrot.slane %v1801_v51, 4 }
 0x35a   : > { %v1808_v50 = vsel %vm1800_vm13, %v1796_v10, -inf }
 0x35b   : > { %v1809_v17 = vrot.slane %v1808_v50, 4  ;;  %v1803_v47 = vmax.f32 %v1801_v51, %v1802_v28  ;;  %v1940_v51 = vld [vmem:[%s3548_s9 + $0x50] sm:$0xff]  ;;  %v1934_v28 = vld [vmem:[%s3548_s9 + $0x20] sm:$0xff] }
 0x35d   : > { %v1810_v14 = vmax.f32 %v1808_v50, %v1809_v17  ;;  %v1804_v9 = vrot.slane %v1803_v47, 2  ;;  %v1944_v50 = vld [vmem:[%s3548_s9 + $0x70] sm:$0xff]  ;;  %v1937_v17 = vld [vmem:[%s3548_s9 + $0x38] sm:$0xff] }
 0x35e   : > { %1948 = vmatpush.msra.mxu3 %v1944_v50 }
 0x35f   : > { %v1811_v59 = vrot.slane %v1810_v14, 2  ;;  %v1805_v56 = vmax.f32 %v1803_v47, %v1804_v9  ;;  %v1930_v47 = vld [vmem:[%s3548_s9] sm:$0xff] }
 0x360   : > { %1949 = vmatpush.msra.mxu3 %v1943_v3 }
 0x361   : > { %v1812_v30 = vmax.f32 %v1810_v14, %v1811_v59  ;;  %v1806_v1 = vrot.slane %v1805_v56, 1  ;;  %v1931_v14 = vld [vmem:[%s3548_s9 + $0x8] sm:$0xff] }
 0x362   : > { %1950 = vmatpush.msra.mxu3 %v1942_v43 }
 0x363   : > { %v1813_v33 = vrot.slane %v1812_v30, 1  ;;  %v1807_v8 = vmax.f32 %v1805_v56, %v1806_v1 }
 0x364   : > { %1951 = vmatpush.msra.mxu3 %v1941_v58 }
 0x365   : > { %v1814_v21 = vmax.f32 %v1812_v30, %v1813_v33 }
 0x366   : > { %1952 = vmatpush.msra.mxu3 %v1940_v51 }
 0x367   : > { %v1867_v27 = vsel %vm1214_vm2, %v1814_v21, %v1807_v8  ;;  %v1857_v63 = vsel %vm1202_vm1, %v1814_v21, %v1807_v8 }
 0x368   : > { %1953 = vmatpush.msra.mxu3 %v1939_v53 }
 0x36a   : > { %1954 = vmatpush.msra.mxu3 %v1938_v18 }
 0x36c   : > { %1955 = vmatpush.msra.mxu3 %v1937_v17 }
 0x36e   : > { %1956 = vmatpush.msra.mxu3 %v1936_v31 }
 0x370   : > { %1957 = vmatpush.msra.mxu3 %v1935_v19 }
 0x372   : > { %1958 = vmatpush.msra.mxu3 %v1934_v28 }
 0x373   : > { %v1789_v34 = vpop.f32.mrf.mxu2 }
 0x374   : > { %v1790_v32 = vadd.f32 %v2160_v29, %v1789_v34  ;;  %1959 = vmatpush.msra.mxu3 %v1933_v45 }
 0x376   : > { %v1793_v54 = vmax.f32 %v1790_v32, 0.0  ;;  %1960 = vmatpush.msra.mxu3 %v1932_v52 }
 0x378   : > { %v1797_v20 = vrot.slane %v1793_v54, 4  ;;  %v1815_v22 = vsel %vm1800_vm13, %v1793_v54, -inf  ;;  %1961 = vmatpush.msra.mxu3 %v1931_v14 }
 0x379   : > { %v1816_v25 = vrot.slane %v1815_v22, 4 }
 0x37a   : > { %v1822_v4 = vsel %vm1800_vm13, %v1797_v20, -inf  ;;  %1962 = vmatpush.msra.mxu3 %v1930_v47 }
 0x37b   : > { %v1817_v6 = vmax.f32 %v1815_v22, %v1816_v25  ;;  %v1823_v61 = vrot.slane %v1822_v4, 4 }
 0x37d   : > { %v1818_v39 = vrot.slane %v1817_v6, 2  ;;  %v1824_v60 = vmax.f32 %v1822_v4, %v1823_v61 }
 0x37f   : > { %v1819_v12 = vmax.f32 %v1817_v6, %v1818_v39  ;;  %v1825_v38 = vrot.slane %v1824_v60, 2 }
 0x381   : > { %v1820_v5 = vrot.slane %v1819_v12, 1  ;;  %v1826_v11 = vmax.f32 %v1824_v60, %v1825_v38 }
 0x383   : > { %v1821_v41 = vmax.f32 %v1819_v12, %v1820_v5  ;;  %v1827_v46 = vrot.slane %v1826_v11, 1 }
 0x385   : > { %v1828_v13 = vmax.f32 %v1826_v11, %v1827_v46  ;;  %v1868_v24 = vsel %vm1202_vm1, %v1821_v41, %v1867_v27  ;;  %v1862_v35 = vsel %vm1214_vm2, %v1821_v41, %v1814_v21  ;;  %v1858_v40 = vsel %vm1204_vm3, %v1821_v41, %v1857_v63 }
 0x386   : > { %v1860_v10 = vsel %vm1272_vm9, 0.0, %v1858_v40 }
 0x387   : > { %v1869_v29 = vsel %vm1204_vm3, %v1828_v13, %v1868_v24  ;;  %v1863_v57 = vsel %vm1202_vm1, %v1828_v13, %v1862_v35 }
 0x388   : > { %1870 = vrot.lane.b32.xlu2 %v1869_v29, %s3621_s15  ;;  %v1866_v26 = vsel %vm1865_vm14, %v1863_v57, 0.0  ;;  %s1990_s15 = scalar_lea.hbm %s3550_s11, %s2314_s21 }
 0x389   : > { %2065 = vmatmul.msk.f32.vlgmr.msra.gmra.mxu2 %vm1447_vm11, %v1866_v26  ;;  %s1994_s25 = sshll.u32 %s1990_s15, 4  ;;  %s1995_s25 = int_to_ptr.hbm [resolvable:$true] %s1994_s25 }
 0x38a   : > { %s2181_s24 = sshra.s32 %s1995_s25, 4  ;;  %s2182_s24 = int_to_ptr.hbm [resolvable:$true] %s2181_s24 }
 0x38b   : > { %s2183_s29 = scalar_lea.hbm %s2182_s24, 1  ;;  %p2188_p0 = scmp.lt.s32.totalorder %s2182_s24, %s3550_s11 }
 0x38c   : > { %p2184_p11 = scmp.ne.s32.totalorder %s2182_s24, %s2183_s29  ;;  %p2189_p1 = scmp.lt.s32.totalorder %s2187_s14, %s2183_s29 }
 0x38e   : > { %p2185_p12 = pnand %p2184_p11, %p2331_p5  ;;  %p2190_p2 = por %p2189_p1, %p2188_p0 }
 0x390   : > { %p2186_p13 = pneg %p2185_p12 }
 0x392   : > { %p2191_p3 = pnand %p2190_p2, %p2186_p13 }
 0x3e2   : > { %v1871_v23 = vpop.permute.xlu2 %1870 }
 0x3e3   : > { %v1873_v55 = vsel %vm1447_vm11, %v1860_v10, %v1871_v23 }
 0x3e4   : > { %1896 = vmatmul.f32.vlgmr.msrb.gmra.mxu3 %v1873_v55 }
 0x40c   : > { %v1917_v59 = vpop.f32.mrf.mxu2 }
 0x467   : > { %v1897_v34 = vpop.f32.mrf.mxu3 }
 0x468   : > { %v1898_v62 = vadd.f32 %v2161_v7, %v1897_v34 }
 0x46a   : > { %v1918_v32 = vadd.f32 %v1917_v59, %v1898_v62 }
 0x46c   : > { %v1920_v15 = vmax.f32 %v1918_v32, 0.0 }
 0x46e   : > { %v1922_v9 = vsel %vm1921_vm15, %v1920_v15, -inf }
 0x46f   : > { %v1923_v54 = vrot.slane %v1922_v9, 4 }
 0x471   : > { %v1924_v2 = vmax.f32 %v1922_v9, %v1923_v54 }
 0x473   : > { %v1925_v30 = vrot.slane %v1924_v2, 2 }
 0x475   : > { %v1926_v20 = vmax.f32 %v1924_v2, %v1925_v30 }
 0x477   : > { %v1927_v22 = vrot.slane %v1926_v20, 1 }
 0x479   : > { %v1928_v25 = vmax.f32 %v1926_v20, %v1927_v22 }
 0x47b   : > { %1963 = vmatmul.f32.vlgmr.msra.gmra.mxu3 %v1928_v25 }
 0x4fe   : > { %v1964_v56 = vpop.f32.mrf.mxu3 }
 0x4ff   : > { %v1965_v4 = vadd.f32 %v1964_v56, %v1946_v48 }
 0x501   : > { %v1968_v6 = vsel %vm1967_vm0, %v1965_v4, -inf }
 0x502   : > { %1969 = vmax.xlane.f32.xlu0 %v1968_v6 }
 0x575   : > { %v1970_v61 = vpop.xlane.xlu0 %1969 }
 0x576   : > { %v1971_v0 = vsub.f32 %v1965_v4, %v1970_v61 }
 0x578   : > { %v1972_v33 = vmul.f32 1.442695, %v1971_v0 }
 0x57a   : > { %2162 = vpow2.f32 %v1972_v33 }
 0x580   : > { %v2163_v39 = vpop.eup %2162 }
 0x581   : > { %v1974_v60 = vsel %vm1967_vm0, %v2163_v39, 0.0 }
 0x582   : > { %1975 = vadd.xlane.f32.xlu1 %v1974_v60 }
 0x5f5   : > { %v1976_v37 = vpop.xlane.xlu1 %1975 }
 0x5f6   : > { %2164 = vlog2.f32 %v1976_v37 }
 0x5fc   : > { %v2165_v1 = vpop.eup %2164 }
 0x5fd   : > { %v1978_v12 = vmul.f32 0.6931472, %v2165_v1 }
 0x5ff   : > { %v1979_v38 = vsub.f32 %v1971_v0, %v1978_v12 }
 0x601   : > { %1980 = vst.msk [vmem:[%s378_s12] sm:$0x1] %vm1967_vm0, %v1979_v38 }
 0x602   : > { %2194 = shalt.err (!%p2191_p3)
}
 0x603   : > { %2117 = dma.vmem_to_hbm [thread:$0]  (%p2331_p5), %s1993_s16, 16, %s1995_s25, %s1982_s22  }
 0x604 PF: > { %p2123_p4 = scmp.ge.s32.totalorder %s2229_s20, 2  ;;  %s2006_s30 = sand.u32 1, %s2217_s17  }
 0x605   : > { %s2007_s12 = scalar_lea.sflag [#allocation3], %s2006_s30 }
 0x606   : > { %p2120_p7 = pnand %p2123_p4, %p2335_p6 }
 0x608   : > { %p2121_p8 = pneg %p2120_p7 }
 0x60a   : > { %2212 = dma.done.wait (%p2121_p8), %s2007_s12, 16  }
 0x60b   : > { %2214 = vsyncadd (%p2121_p8), %s2007_s12, 4294967280  ;;  %p21_p9 = scmp.ge.s32.totalorder %s2318_s23, 4   ;;  %s3622_s17 = smov %s2221_s18 }
 0x60c   : > { %s3623_s18 = smov %s2225_s19  ;;  %s3624_s19 = smov %s2329_s26 }
 0x60d   : > { %s3625_s20 = smov %s2318_s23  ;;  %23 = sbr.rel (!%p21_p9) target bundleno = 5 (0x5), region = 99 }
 0x612   :  { %2012 = vsyncpa [#allocation3], 1 }
 0x613   :  { %2014 = vsyncpa [#allocation3 + $0x1], 1 }

</bundles_post_ra>
